<compile_context>
chip_gen: v6e
topology: v6e:2x2x1
jax: 0.10.0
libtpu: 0.0.40
codegen_flags: <defaults>
</compile_context>

<pallas_src>
import jax
import jax.numpy as jnp
from jax.experimental import pallas as pl
from jax.experimental.pallas import tpu as pltpu

_LANE = 128


def _round_up(n, m):
    return ((n + m - 1) // m) * m


# -----------------------------------------------------------------------------
# Kernel
# -----------------------------------------------------------------------------
def lili_encoder_kernel(x_ref, h0_ref, c0_ref, wih_ref, whh_ref, b_ref,
                        wfc_ref, bfc_ref,
                        latent_ref, hn_ref, cn_ref,
                        gx_ref):
    """LSTM recurrence + final Linear, fully VMEM-resident.

    Layout (Hp/Lp = H/L padded to 128 lanes; gate order i|f|o|g):
      x   (B, T, I) f32        wih (I, 4Hp) bf16      whh (Hp, 4Hp) bf16
      b   (1, 4Hp)  f32        wfc (Hp, Lp) bf16      bfc (1, Lp)   f32
      h0/c0 (B, Hp) f32        gx_ref (B, T, 4Hp) f32 scratch
      latent (B, Lp) f32, hn/cn (B, Hp) f32
    """
    B, T, I = x_ref.shape
    Hp = h0_ref.shape[-1]

    # ---- Stage 1: hoisted input projection -- ONE big MXU matmul ------------
    # (B, T, I) -> (B*T, I) is a tile-aligned, zero-cost reshape (T == 8 sublanes).
    x_flat = x_ref[...].reshape(B * T, I).astype(jnp.bfloat16)
    gx = jnp.dot(x_flat, wih_ref[...], preferred_element_type=jnp.float32)
    gx = gx + b_ref[...]                              # bias folded in ONCE (loop-invariant)
    for b in range(B):                                # static, tile-aligned row blocks
        gx_ref[b] = gx[b * T:(b + 1) * T, :]

    # ---- Stage 2: recurrence, fully unrolled (static T) ---------------------
    h = h0_ref[...]                                   # (B, Hp) f32 state
    c = c0_ref[...]

    for t in range(T):                                # Python unroll => static indices,
        # only ONE small matmul left on the serial critical path per step:
        gates = gx_ref[:, t, :] + jnp.dot(
            h.astype(jnp.bfloat16), whh_ref[...],
            preferred_element_type=jnp.float32)       # (B, 4Hp) f32

        # i|f|o gates: single EUP pass over a contiguous, 128-lane-aligned 3Hp slab.
        sig = 0.5 * (jnp.tanh(0.5 * gates[:, :3 * Hp]) + 1.0)
        i_g = sig[:, 0 * Hp:1 * Hp]
        f_g = sig[:, 1 * Hp:2 * Hp]
        o_g = sig[:, 2 * Hp:3 * Hp]
        g_g = jnp.tanh(gates[:, 3 * Hp:])

        c = f_g * c + i_g * g_g
        h = o_g * jnp.tanh(c)

    hn_ref[...] = h
    cn_ref[...] = c
    # Final Linear on the CELL state: the PyTorch module computes fc(hidden[1]) == fc(c_n).
    latent_ref[...] = (
        jnp.dot(c.astype(jnp.bfloat16), wfc_ref[...],
                preferred_element_type=jnp.float32) + bfc_ref[...])


# -----------------------------------------------------------------------------
# Parameter packing (PyTorch layout -> kernel layout)
# -----------------------------------------------------------------------------
def _pack_gate_matrix(w, hp, n_rows):
    """PyTorch (4H, K) gate-stacked matrix (order i|f|g|o, left-multiply) ->
    (n_rows, 4*hp) right-multiply matrix, gate order i|f|o|g, each gate padded to hp
    output lanes, contraction dim zero-padded K -> n_rows."""
    four_h, k_dim = w.shape
    h_dim = four_h // 4
    gi, gf, gg, go = jnp.split(w, 4, axis=0)
    out = jnp.zeros((n_rows, 4 * hp), w.dtype)
    for slot, g in enumerate((gi, gf, go, gg)):       # i | f | o | g
        out = out.at[:k_dim, slot * hp:slot * hp + h_dim].set(g.T)
    return out


def _pack_gate_bias(b, hp):
    h_dim = b.shape[0] // 4
    bi, bf, bg, bo = jnp.split(b, 4)
    out = jnp.zeros((1, 4 * hp), b.dtype)
    for slot, g in enumerate((bi, bf, bo, bg)):       # i | f | o | g
        out = out.at[0, slot * hp:slot * hp + h_dim].set(g)
    return out


def _pad2d(a, rows, cols):
    return jnp.zeros((rows, cols), a.dtype).at[:a.shape[0], :a.shape[1]].set(a)


# -----------------------------------------------------------------------------
# Wrapper
# -----------------------------------------------------------------------------
@jax.jit
def lili_encoder(x, hidden, params):
    """x: (B, T, I) batch_first; hidden = (h0, c0), each (1, B, H).
    params: PyTorch layout (w_ih (4H,I), w_hh (4H,H), b_ih (4H,), b_hh (4H,),
    w_fc (L,H), b_fc (L,)), LSTM gate order i|f|g|o.
    Returns (latent, (h_n, c_n)) with latent (1, B, L), matching the PyTorch module."""
    w_ih, w_hh, b_ih, b_hh, w_fc, b_fc = params
    h0, c0 = hidden
    B, T, I = x.shape
    H = w_hh.shape[1]
    L = w_fc.shape[0]
    Hp = _round_up(H, _LANE)          # lane-aligned gate blocks
    Lp = _round_up(L, _LANE)          # lane-dense latent output

    # Pack weights: i|f|o|g order, right-multiply form, lane-padded, bf16 for the MXU.
    w_ih_k = _pack_gate_matrix(w_ih, Hp, I).astype(jnp.bfloat16)       # (I, 4Hp)
    w_hh_k = _pack_gate_matrix(w_hh, Hp, Hp).astype(jnp.bfloat16)      # (Hp, 4Hp)
    b_k = _pack_gate_bias(b_ih + b_hh, Hp).astype(jnp.float32)         # (1, 4Hp)
    w_fc_k = _pad2d(w_fc.T, Hp, Lp).astype(jnp.bfloat16)               # (Hp, Lp)
    b_fc_k = _pad2d(b_fc[None, :], 1, Lp).astype(jnp.float32)          # (1, Lp)
    h0_k = _pad2d(h0[0], B, Hp).astype(jnp.float32)                    # (B, Hp)
    c0_k = _pad2d(c0[0], B, Hp).astype(jnp.float32)                    # (B, Hp)

    vmem = pl.BlockSpec(memory_space=pltpu.MemorySpace.VMEM)

    cost = pl.CostEstimate(
        flops=(2 * B * T * I * 4 * Hp            # hoisted input projection
               + 2 * T * B * Hp * 4 * Hp         # recurrent matmuls
               + 2 * B * Hp * Lp                 # final fc
               + 12 * T * B * Hp),               # gate elementwise
        transcendentals=T * B * 5 * Hp,
        bytes_accessed=(x.size * 4 + (h0_k.size + c0_k.size) * 4
                        + (w_ih_k.size + w_hh_k.size + w_fc_k.size) * 2
                        + (b_k.size + b_fc_k.size) * 4
                        + (B * Lp + 2 * B * Hp) * 4),
    )

    latent_p, hn_p, cn_p = pl.pallas_call(
        lili_encoder_kernel,
        out_shape=(
            jax.ShapeDtypeStruct((B, Lp), jnp.float32),
            jax.ShapeDtypeStruct((B, Hp), jnp.float32),
            jax.ShapeDtypeStruct((B, Hp), jnp.float32),
        ),
        in_specs=[vmem] * 8,
        out_specs=(vmem, vmem, vmem),
        scratch_shapes=[pltpu.VMEM((B, T, 4 * Hp), jnp.float32)],
        compiler_params=pltpu.CompilerParams(vmem_limit_bytes=32 * 1024 * 1024),
        cost_estimate=cost,
    )(x, h0_k, c0_k, w_ih_k, w_hh_k, b_k, w_fc_k, b_fc_k)

    latent = latent_p[:, :L][None]            # (1, B, L)
    h_n = hn_p[:, :H][None]                   # (1, B, H)
    c_n = cn_p[:, :H][None]                   # (1, B, H)
    return latent, (h_n, c_n)


# -----------------------------------------------------------------------------
# Synthetic params + pure-JAX reference (mirrors torch.nn.LSTM + Linear exactly)
# -----------------------------------------------------------------------------
def make_params(key, input_size, hidden_size, latent_size):
    """Same shapes / layout as nn.LSTM + nn.Linear (gate order i|f|g|o)."""
    ks = jax.random.split(key, 6)
    s = 1.0 / float(hidden_size) ** 0.5
    u = lambda k, shape: jax.random.uniform(k, shape, jnp.float32, -s, s)
    w_ih = u(ks[0], (4 * hidden_size, input_size))
    w_hh = u(ks[1], (4 * hidden_size, hidden_size))
    b_ih = u(ks[2], (4 * hidden_size,))
    b_hh = u(ks[3], (4 * hidden_size,))
    w_fc = u(ks[4], (latent_size, hidden_size))
    b_fc = u(ks[5], (latent_size,))
    return (w_ih, w_hh, b_ih, b_hh, w_fc, b_fc)


def reference(x, hidden, params, matmul_dtype=jnp.float32):
    """Pure-JAX mirror of the PyTorch module.  matmul_dtype=jnp.bfloat16 reproduces the
    kernel's bf16-operand / f32-accumulate matmul precision for a tight check."""
    w_ih, w_hh, b_ih, b_hh, w_fc, b_fc = params
    h, c = hidden[0][0], hidden[1][0]
    H = h.shape[-1]
    bias = (b_ih + b_hh)[None, :]

    def mm(a, w):
        return jnp.dot(a.astype(matmul_dtype), w.T.astype(matmul_dtype),
                       preferred_element_type=jnp.float32)

    for t in range(x.shape[1]):
        gates = mm(x[:, t, :], w_ih) + mm(h, w_hh) + bias
        i = jax.nn.sigmoid(gates[:, 0:H])
        f = jax.nn.sigmoid(gates[:, H:2 * H])
        g = jnp.tanh(gates[:, 2 * H:3 * H])
        o = jax.nn.sigmoid(gates[:, 3 * H:4 * H])
        c = f * c + i * g
        h = o * jnp.tanh(c)
    latent = mm(c, w_fc) + b_fc[None, :]
    return latent[None], (h[None], c[None])


if __name__ == "__main__":
    B, T, I, H, L = 2, 8, 16, 32, 8

    key = jax.random.PRNGKey(0)
    k_x, k_h, k_c, k_p = jax.random.split(key, 4)
    x = jax.random.normal(k_x, (B, T, I), jnp.float32)
    h0 = jax.random.normal(k_h, (1, B, H), jnp.float32)
    c0 = jax.random.normal(k_c, (1, B, H), jnp.float32)
    params = make_params(k_p, I, H, L)

    latent, (h_n, c_n) = lili_encoder(x, (h0, c0), params)
    jax.block_until_ready((latent, h_n, c_n))

    assert latent.shape == (1, B, L) and h_n.shape == (1, B, H) and c_n.shape == (1, B, H)

    # Tight check against a reference using the SAME matmul precision as the kernel
    # (bf16 operands, f32 accumulate): verifies the kernel math.
    lat_mp, (h_mp, c_mp) = reference(x, (h0, c0), params, matmul_dtype=jnp.bfloat16)
    assert jnp.allclose(latent, lat_mp, atol=2e-3, rtol=2e-3)
    assert jnp.allclose(h_n, h_mp, atol=2e-3, rtol=2e-3)
    assert jnp.allclose(c_n, c_mp, atol=2e-3, rtol=2e-3)

    # Loose check against the full-f32 reference: bounds the bf16 weight-quantization drift.
    lat_fp, (h_fp, c_fp) = reference(x, (h0, c0), params, matmul_dtype=jnp.float32)
    assert jnp.allclose(latent, lat_fp, atol=5e-2, rtol=5e-2)
    assert jnp.allclose(h_n, h_fp, atol=5e-2, rtol=5e-2)
    assert jnp.allclose(c_n, c_fp, atol=5e-2, rtol=5e-2)

    print("KERNEL_OK")
</pallas_src>

<mosaic_0001>
module attributes {stable_mosaic.version = 11 : i64} {
  func.func @lili_encoder_kernel(%arg0: memref<2x8x16xf32, #tpu.memory_space<vmem>>, %arg1: memref<2x128xf32, #tpu.memory_space<vmem>>, %arg2: memref<2x128xf32, #tpu.memory_space<vmem>>, %arg3: memref<16x512xbf16, #tpu.memory_space<vmem>>, %arg4: memref<128x512xbf16, #tpu.memory_space<vmem>>, %arg5: memref<1x512xf32, #tpu.memory_space<vmem>>, %arg6: memref<128x128xbf16, #tpu.memory_space<vmem>>, %arg7: memref<1x128xf32, #tpu.memory_space<vmem>>, %arg8: memref<2x128xf32, #tpu.memory_space<vmem>>, %arg9: memref<2x128xf32, #tpu.memory_space<vmem>>, %arg10: memref<2x128xf32, #tpu.memory_space<vmem>>, %arg11: memref<2x8x512xf32, #tpu.memory_space<vmem>>) attributes {dimension_semantics = [], scalar_prefetch = 0 : i64, scratch_operands = 1 : i64, tpu.core_type = #tpu.core_type<tc>} {
    %c0 = arith.constant 0 : index
    %c0_0 = arith.constant 0 : index
    %c0_1 = arith.constant 0 : index
    %0 = vector.load %arg0[%c0, %c0_0, %c0_1] : memref<2x8x16xf32, #tpu.memory_space<vmem>>, vector<2x8x16xf32>
    %1 = vector.shape_cast %0 : vector<2x8x16xf32> to vector<16x16xf32>
    %2 = arith.truncf %1 : vector<16x16xf32> to vector<16x16xbf16>
    %c0_2 = arith.constant 0 : index
    %c0_3 = arith.constant 0 : index
    %3 = vector.load %arg3[%c0_2, %c0_3] : memref<16x512xbf16, #tpu.memory_space<vmem>>, vector<16x512xbf16>
    %cst = arith.constant dense<0.000000e+00> : vector<16x512xf32>
    %4 = tpu.matmul %2, %3, %cst {dimension_numbers = #tpu.dot_dimension_numbers<[1], [0], [0], [1], [0, 0, 1, 1], [], []>} : vector<16x16xbf16>, vector<16x512xbf16>, vector<16x512xf32> -> vector<16x512xf32>
    %c0_4 = arith.constant 0 : index
    %c0_5 = arith.constant 0 : index
    %5 = vector.load %arg5[%c0_4, %c0_5] : memref<1x512xf32, #tpu.memory_space<vmem>>, vector<1x512xf32>
    %6 = vector.broadcast %5 : vector<1x512xf32> to vector<16x512xf32>
    %7 = arith.addf %4, %6 : vector<16x512xf32>
    %8 = vector.extract_strided_slice %7 {offsets = [0, 0], sizes = [8, 512], strides = [1, 1]} : vector<16x512xf32> to vector<8x512xf32>
    %c0_6 = arith.constant 0 : index
    %c0_7 = arith.constant 0 : index
    %c0_8 = arith.constant 0 : index
    %9 = vector.load %arg11[%c0_6, %c0_7, %c0_8] : memref<2x8x512xf32, #tpu.memory_space<vmem>>, vector<1x8x512xf32>
    %10 = vector.shape_cast %9 : vector<1x8x512xf32> to vector<8x512xf32>
    %11 = vector.shape_cast %8 : vector<8x512xf32> to vector<1x8x512xf32>
    tpu.vector_store %arg11[%c0_6, %c0_7, %c0_8], %11 {strides = array<i32>} : memref<2x8x512xf32, #tpu.memory_space<vmem>>, vector<1x8x512xf32>,
    %12 = vector.extract_strided_slice %7 {offsets = [8, 0], sizes = [8, 512], strides = [1, 1]} : vector<16x512xf32> to vector<8x512xf32>
    %c1 = arith.constant 1 : index
    %c0_9 = arith.constant 0 : index
    %c0_10 = arith.constant 0 : index
    %13 = vector.load %arg11[%c1, %c0_9, %c0_10] : memref<2x8x512xf32, #tpu.memory_space<vmem>>, vector<1x8x512xf32>
    %14 = vector.shape_cast %13 : vector<1x8x512xf32> to vector<8x512xf32>
    %15 = vector.shape_cast %12 : vector<8x512xf32> to vector<1x8x512xf32>
    tpu.vector_store %arg11[%c1, %c0_9, %c0_10], %15 {strides = array<i32>} : memref<2x8x512xf32, #tpu.memory_space<vmem>>, vector<1x8x512xf32>,
    %c0_11 = arith.constant 0 : index
    %c0_12 = arith.constant 0 : index
    %16 = vector.load %arg1[%c0_11, %c0_12] : memref<2x128xf32, #tpu.memory_space<vmem>>, vector<2x128xf32>
    %c0_13 = arith.constant 0 : index
    %c0_14 = arith.constant 0 : index
    %17 = vector.load %arg2[%c0_13, %c0_14] : memref<2x128xf32, #tpu.memory_space<vmem>>, vector<2x128xf32>
    %c0_15 = arith.constant 0 : index
    %c0_16 = arith.constant 0 : index
    %c0_17 = arith.constant 0 : index
    %18 = vector.load %arg11[%c0_15, %c0_16, %c0_17] : memref<2x8x512xf32, #tpu.memory_space<vmem>>, vector<2x1x512xf32>
    %19 = vector.shape_cast %18 : vector<2x1x512xf32> to vector<2x512xf32>
    %20 = arith.truncf %16 : vector<2x128xf32> to vector<2x128xbf16>
    %c0_18 = arith.constant 0 : index
    %c0_19 = arith.constant 0 : index
    %21 = vector.load %arg4[%c0_18, %c0_19] : memref<128x512xbf16, #tpu.memory_space<vmem>>, vector<128x512xbf16>
    %cst_20 = arith.constant dense<0.000000e+00> : vector<2x512xf32>
    %22 = tpu.matmul %20, %21, %cst_20 {dimension_numbers = #tpu.dot_dimension_numbers<[1], [0], [0], [1], [0, 0, 1, 1], [], []>} : vector<2x128xbf16>, vector<128x512xbf16>, vector<2x512xf32> -> vector<2x512xf32>
    %23 = arith.addf %19, %22 : vector<2x512xf32>
    %24 = vector.extract_strided_slice %23 {offsets = [0, 0], sizes = [2, 384], strides = [1, 1]} : vector<2x512xf32> to vector<2x384xf32>
    %cst_21 = arith.constant 5.000000e-01 : f32
    %25 = vector.broadcast %cst_21 : f32 to vector<2x384xf32>
    %26 = arith.mulf %25, %24 : vector<2x384xf32>
    %27 = math.tanh %26 : vector<2x384xf32>
    %cst_22 = arith.constant 1.000000e+00 : f32
    %28 = vector.broadcast %cst_22 : f32 to vector<2x384xf32>
    %29 = arith.addf %27, %28 : vector<2x384xf32>
    %cst_23 = arith.constant 5.000000e-01 : f32
    %30 = vector.broadcast %cst_23 : f32 to vector<2x384xf32>
    %31 = arith.mulf %30, %29 : vector<2x384xf32>
    %32 = vector.extract_strided_slice %31 {offsets = [0, 0], sizes = [2, 128], strides = [1, 1]} : vector<2x384xf32> to vector<2x128xf32>
    %33 = vector.extract_strided_slice %31 {offsets = [0, 128], sizes = [2, 128], strides = [1, 1]} : vector<2x384xf32> to vector<2x128xf32>
    %34 = vector.extract_strided_slice %31 {offsets = [0, 256], sizes = [2, 128], strides = [1, 1]} : vector<2x384xf32> to vector<2x128xf32>
    %35 = vector.extract_strided_slice %23 {offsets = [0, 384], sizes = [2, 128], strides = [1, 1]} : vector<2x512xf32> to vector<2x128xf32>
    %36 = math.tanh %35 : vector<2x128xf32>
    %37 = arith.mulf %33, %17 : vector<2x128xf32>
    %38 = arith.mulf %32, %36 : vector<2x128xf32>
    %39 = arith.addf %37, %38 : vector<2x128xf32>
    %40 = math.tanh %39 : vector<2x128xf32>
    %41 = arith.mulf %34, %40 : vector<2x128xf32>
    %c0_24 = arith.constant 0 : index
    %c1_25 = arith.constant 1 : index
    %c0_26 = arith.constant 0 : index
    %42 = vector.load %arg11[%c0_24, %c1_25, %c0_26] : memref<2x8x512xf32, #tpu.memory_space<vmem>>, vector<2x1x512xf32>
    %43 = vector.shape_cast %42 : vector<2x1x512xf32> to vector<2x512xf32>
    %44 = arith.truncf %41 : vector<2x128xf32> to vector<2x128xbf16>
    %c0_27 = arith.constant 0 : index
    %c0_28 = arith.constant 0 : index
    %45 = vector.load %arg4[%c0_27, %c0_28] : memref<128x512xbf16, #tpu.memory_space<vmem>>, vector<128x512xbf16>
    %cst_29 = arith.constant dense<0.000000e+00> : vector<2x512xf32>
    %46 = tpu.matmul %44, %45, %cst_29 {dimension_numbers = #tpu.dot_dimension_numbers<[1], [0], [0], [1], [0, 0, 1, 1], [], []>} : vector<2x128xbf16>, vector<128x512xbf16>, vector<2x512xf32> -> vector<2x512xf32>
    %47 = arith.addf %43, %46 : vector<2x512xf32>
    %48 = vector.extract_strided_slice %47 {offsets = [0, 0], sizes = [2, 384], strides = [1, 1]} : vector<2x512xf32> to vector<2x384xf32>
    %cst_30 = arith.constant 5.000000e-01 : f32
    %49 = vector.broadcast %cst_30 : f32 to vector<2x384xf32>
    %50 = arith.mulf %49, %48 : vector<2x384xf32>
    %51 = math.tanh %50 : vector<2x384xf32>
    %cst_31 = arith.constant 1.000000e+00 : f32
    %52 = vector.broadcast %cst_31 : f32 to vector<2x384xf32>
    %53 = arith.addf %51, %52 : vector<2x384xf32>
    %cst_32 = arith.constant 5.000000e-01 : f32
    %54 = vector.broadcast %cst_32 : f32 to vector<2x384xf32>
    %55 = arith.mulf %54, %53 : vector<2x384xf32>
    %56 = vector.extract_strided_slice %55 {offsets = [0, 0], sizes = [2, 128], strides = [1, 1]} : vector<2x384xf32> to vector<2x128xf32>
    %57 = vector.extract_strided_slice %55 {offsets = [0, 128], sizes = [2, 128], strides = [1, 1]} : vector<2x384xf32> to vector<2x128xf32>
    %58 = vector.extract_strided_slice %55 {offsets = [0, 256], sizes = [2, 128], strides = [1, 1]} : vector<2x384xf32> to vector<2x128xf32>
    %59 = vector.extract_strided_slice %47 {offsets = [0, 384], sizes = [2, 128], strides = [1, 1]} : vector<2x512xf32> to vector<2x128xf32>
    %60 = math.tanh %59 : vector<2x128xf32>
    %61 = arith.mulf %57, %39 : vector<2x128xf32>
    %62 = arith.mulf %56, %60 : vector<2x128xf32>
    %63 = arith.addf %61, %62 : vector<2x128xf32>
    %64 = math.tanh %63 : vector<2x128xf32>
    %65 = arith.mulf %58, %64 : vector<2x128xf32>
    %c0_33 = arith.constant 0 : index
    %c2 = arith.constant 2 : index
    %c0_34 = arith.constant 0 : index
    %66 = vector.load %arg11[%c0_33, %c2, %c0_34] : memref<2x8x512xf32, #tpu.memory_space<vmem>>, vector<2x1x512xf32>
    %67 = vector.shape_cast %66 : vector<2x1x512xf32> to vector<2x512xf32>
    %68 = arith.truncf %65 : vector<2x128xf32> to vector<2x128xbf16>
    %c0_35 = arith.constant 0 : index
    %c0_36 = arith.constant 0 : index
    %69 = vector.load %arg4[%c0_35, %c0_36] : memref<128x512xbf16, #tpu.memory_space<vmem>>, vector<128x512xbf16>
    %cst_37 = arith.constant dense<0.000000e+00> : vector<2x512xf32>
    %70 = tpu.matmul %68, %69, %cst_37 {dimension_numbers = #tpu.dot_dimension_numbers<[1], [0], [0], [1], [0, 0, 1, 1], [], []>} : vector<2x128xbf16>, vector<128x512xbf16>, vector<2x512xf32> -> vector<2x512xf32>
    %71 = arith.addf %67, %70 : vector<2x512xf32>
    %72 = vector.extract_strided_slice %71 {offsets = [0, 0], sizes = [2, 384], strides = [1, 1]} : vector<2x512xf32> to vector<2x384xf32>
    %cst_38 = arith.constant 5.000000e-01 : f32
    %73 = vector.broadcast %cst_38 : f32 to vector<2x384xf32>
    %74 = arith.mulf %73, %72 : vector<2x384xf32>
    %75 = math.tanh %74 : vector<2x384xf32>
    %cst_39 = arith.constant 1.000000e+00 : f32
    %76 = vector.broadcast %cst_39 : f32 to vector<2x384xf32>
    %77 = arith.addf %75, %76 : vector<2x384xf32>
    %cst_40 = arith.constant 5.000000e-01 : f32
    %78 = vector.broadcast %cst_40 : f32 to vector<2x384xf32>
    %79 = arith.mulf %78, %77 : vector<2x384xf32>
    %80 = vector.extract_strided_slice %79 {offsets = [0, 0], sizes = [2, 128], strides = [1, 1]} : vector<2x384xf32> to vector<2x128xf32>
    %81 = vector.extract_strided_slice %79 {offsets = [0, 128], sizes = [2, 128], strides = [1, 1]} : vector<2x384xf32> to vector<2x128xf32>
    %82 = vector.extract_strided_slice %79 {offsets = [0, 256], sizes = [2, 128], strides = [1, 1]} : vector<2x384xf32> to vector<2x128xf32>
    %83 = vector.extract_strided_slice %71 {offsets = [0, 384], sizes = [2, 128], strides = [1, 1]} : vector<2x512xf32> to vector<2x128xf32>
    %84 = math.tanh %83 : vector<2x128xf32>
    %85 = arith.mulf %81, %63 : vector<2x128xf32>
    %86 = arith.mulf %80, %84 : vector<2x128xf32>
    %87 = arith.addf %85, %86 : vector<2x128xf32>
    %88 = math.tanh %87 : vector<2x128xf32>
    %89 = arith.mulf %82, %88 : vector<2x128xf32>
    %c0_41 = arith.constant 0 : index
    %c3 = arith.constant 3 : index
    %c0_42 = arith.constant 0 : index
    %90 = vector.load %arg11[%c0_41, %c3, %c0_42] : memref<2x8x512xf32, #tpu.memory_space<vmem>>, vector<2x1x512xf32>
    %91 = vector.shape_cast %90 : vector<2x1x512xf32> to vector<2x512xf32>
    %92 = arith.truncf %89 : vector<2x128xf32> to vector<2x128xbf16>
    %c0_43 = arith.constant 0 : index
    %c0_44 = arith.constant 0 : index
    %93 = vector.load %arg4[%c0_43, %c0_44] : memref<128x512xbf16, #tpu.memory_space<vmem>>, vector<128x512xbf16>
    %cst_45 = arith.constant dense<0.000000e+00> : vector<2x512xf32>
    %94 = tpu.matmul %92, %93, %cst_45 {dimension_numbers = #tpu.dot_dimension_numbers<[1], [0], [0], [1], [0, 0, 1, 1], [], []>} : vector<2x128xbf16>, vector<128x512xbf16>, vector<2x512xf32> -> vector<2x512xf32>
    %95 = arith.addf %91, %94 : vector<2x512xf32>
    %96 = vector.extract_strided_slice %95 {offsets = [0, 0], sizes = [2, 384], strides = [1, 1]} : vector<2x512xf32> to vector<2x384xf32>
    %cst_46 = arith.constant 5.000000e-01 : f32
    %97 = vector.broadcast %cst_46 : f32 to vector<2x384xf32>
    %98 = arith.mulf %97, %96 : vector<2x384xf32>
    %99 = math.tanh %98 : vector<2x384xf32>
    %cst_47 = arith.constant 1.000000e+00 : f32
    %100 = vector.broadcast %cst_47 : f32 to vector<2x384xf32>
    %101 = arith.addf %99, %100 : vector<2x384xf32>
    %cst_48 = arith.constant 5.000000e-01 : f32
    %102 = vector.broadcast %cst_48 : f32 to vector<2x384xf32>
    %103 = arith.mulf %102, %101 : vector<2x384xf32>
    %104 = vector.extract_strided_slice %103 {offsets = [0, 0], sizes = [2, 128], strides = [1, 1]} : vector<2x384xf32> to vector<2x128xf32>
    %105 = vector.extract_strided_slice %103 {offsets = [0, 128], sizes = [2, 128], strides = [1, 1]} : vector<2x384xf32> to vector<2x128xf32>
    %106 = vector.extract_strided_slice %103 {offsets = [0, 256], sizes = [2, 128], strides = [1, 1]} : vector<2x384xf32> to vector<2x128xf32>
    %107 = vector.extract_strided_slice %95 {offsets = [0, 384], sizes = [2, 128], strides = [1, 1]} : vector<2x512xf32> to vector<2x128xf32>
    %108 = math.tanh %107 : vector<2x128xf32>
    %109 = arith.mulf %105, %87 : vector<2x128xf32>
    %110 = arith.mulf %104, %108 : vector<2x128xf32>
    %111 = arith.addf %109, %110 : vector<2x128xf32>
    %112 = math.tanh %111 : vector<2x128xf32>
    %113 = arith.mulf %106, %112 : vector<2x128xf32>
    %c0_49 = arith.constant 0 : index
    %c4 = arith.constant 4 : index
    %c0_50 = arith.constant 0 : index
    %114 = vector.load %arg11[%c0_49, %c4, %c0_50] : memref<2x8x512xf32, #tpu.memory_space<vmem>>, vector<2x1x512xf32>
    %115 = vector.shape_cast %114 : vector<2x1x512xf32> to vector<2x512xf32>
    %116 = arith.truncf %113 : vector<2x128xf32> to vector<2x128xbf16>
    %c0_51 = arith.constant 0 : index
    %c0_52 = arith.constant 0 : index
    %117 = vector.load %arg4[%c0_51, %c0_52] : memref<128x512xbf16, #tpu.memory_space<vmem>>, vector<128x512xbf16>
    %cst_53 = arith.constant dense<0.000000e+00> : vector<2x512xf32>
    %118 = tpu.matmul %116, %117, %cst_53 {dimension_numbers = #tpu.dot_dimension_numbers<[1], [0], [0], [1], [0, 0, 1, 1], [], []>} : vector<2x128xbf16>, vector<128x512xbf16>, vector<2x512xf32> -> vector<2x512xf32>
    %119 = arith.addf %115, %118 : vector<2x512xf32>
    %120 = vector.extract_strided_slice %119 {offsets = [0, 0], sizes = [2, 384], strides = [1, 1]} : vector<2x512xf32> to vector<2x384xf32>
    %cst_54 = arith.constant 5.000000e-01 : f32
    %121 = vector.broadcast %cst_54 : f32 to vector<2x384xf32>
    %122 = arith.mulf %121, %120 : vector<2x384xf32>
    %123 = math.tanh %122 : vector<2x384xf32>
    %cst_55 = arith.constant 1.000000e+00 : f32
    %124 = vector.broadcast %cst_55 : f32 to vector<2x384xf32>
    %125 = arith.addf %123, %124 : vector<2x384xf32>
    %cst_56 = arith.constant 5.000000e-01 : f32
    %126 = vector.broadcast %cst_56 : f32 to vector<2x384xf32>
    %127 = arith.mulf %126, %125 : vector<2x384xf32>
    %128 = vector.extract_strided_slice %127 {offsets = [0, 0], sizes = [2, 128], strides = [1, 1]} : vector<2x384xf32> to vector<2x128xf32>
    %129 = vector.extract_strided_slice %127 {offsets = [0, 128], sizes = [2, 128], strides = [1, 1]} : vector<2x384xf32> to vector<2x128xf32>
    %130 = vector.extract_strided_slice %127 {offsets = [0, 256], sizes = [2, 128], strides = [1, 1]} : vector<2x384xf32> to vector<2x128xf32>
    %131 = vector.extract_strided_slice %119 {offsets = [0, 384], sizes = [2, 128], strides = [1, 1]} : vector<2x512xf32> to vector<2x128xf32>
    %132 = math.tanh %131 : vector<2x128xf32>
    %133 = arith.mulf %129, %111 : vector<2x128xf32>
    %134 = arith.mulf %128, %132 : vector<2x128xf32>
    %135 = arith.addf %133, %134 : vector<2x128xf32>
    %136 = math.tanh %135 : vector<2x128xf32>
    %137 = arith.mulf %130, %136 : vector<2x128xf32>
    %c0_57 = arith.constant 0 : index
    %c5 = arith.constant 5 : index
    %c0_58 = arith.constant 0 : index
    %138 = vector.load %arg11[%c0_57, %c5, %c0_58] : memref<2x8x512xf32, #tpu.memory_space<vmem>>, vector<2x1x512xf32>
    %139 = vector.shape_cast %138 : vector<2x1x512xf32> to vector<2x512xf32>
    %140 = arith.truncf %137 : vector<2x128xf32> to vector<2x128xbf16>
    %c0_59 = arith.constant 0 : index
    %c0_60 = arith.constant 0 : index
    %141 = vector.load %arg4[%c0_59, %c0_60] : memref<128x512xbf16, #tpu.memory_space<vmem>>, vector<128x512xbf16>
    %cst_61 = arith.constant dense<0.000000e+00> : vector<2x512xf32>
    %142 = tpu.matmul %140, %141, %cst_61 {dimension_numbers = #tpu.dot_dimension_numbers<[1], [0], [0], [1], [0, 0, 1, 1], [], []>} : vector<2x128xbf16>, vector<128x512xbf16>, vector<2x512xf32> -> vector<2x512xf32>
    %143 = arith.addf %139, %142 : vector<2x512xf32>
    %144 = vector.extract_strided_slice %143 {offsets = [0, 0], sizes = [2, 384], strides = [1, 1]} : vector<2x512xf32> to vector<2x384xf32>
    %cst_62 = arith.constant 5.000000e-01 : f32
    %145 = vector.broadcast %cst_62 : f32 to vector<2x384xf32>
    %146 = arith.mulf %145, %144 : vector<2x384xf32>
    %147 = math.tanh %146 : vector<2x384xf32>
    %cst_63 = arith.constant 1.000000e+00 : f32
    %148 = vector.broadcast %cst_63 : f32 to vector<2x384xf32>
    %149 = arith.addf %147, %148 : vector<2x384xf32>
    %cst_64 = arith.constant 5.000000e-01 : f32
    %150 = vector.broadcast %cst_64 : f32 to vector<2x384xf32>
    %151 = arith.mulf %150, %149 : vector<2x384xf32>
    %152 = vector.extract_strided_slice %151 {offsets = [0, 0], sizes = [2, 128], strides = [1, 1]} : vector<2x384xf32> to vector<2x128xf32>
    %153 = vector.extract_strided_slice %151 {offsets = [0, 128], sizes = [2, 128], strides = [1, 1]} : vector<2x384xf32> to vector<2x128xf32>
    %154 = vector.extract_strided_slice %151 {offsets = [0, 256], sizes = [2, 128], strides = [1, 1]} : vector<2x384xf32> to vector<2x128xf32>
    %155 = vector.extract_strided_slice %143 {offsets = [0, 384], sizes = [2, 128], strides = [1, 1]} : vector<2x512xf32> to vector<2x128xf32>
    %156 = math.tanh %155 : vector<2x128xf32>
    %157 = arith.mulf %153, %135 : vector<2x128xf32>
    %158 = arith.mulf %152, %156 : vector<2x128xf32>
    %159 = arith.addf %157, %158 : vector<2x128xf32>
    %160 = math.tanh %159 : vector<2x128xf32>
    %161 = arith.mulf %154, %160 : vector<2x128xf32>
    %c0_65 = arith.constant 0 : index
    %c6 = arith.constant 6 : index
    %c0_66 = arith.constant 0 : index
    %162 = vector.load %arg11[%c0_65, %c6, %c0_66] : memref<2x8x512xf32, #tpu.memory_space<vmem>>, vector<2x1x512xf32>
    %163 = vector.shape_cast %162 : vector<2x1x512xf32> to vector<2x512xf32>
    %164 = arith.truncf %161 : vector<2x128xf32> to vector<2x128xbf16>
    %c0_67 = arith.constant 0 : index
    %c0_68 = arith.constant 0 : index
    %165 = vector.load %arg4[%c0_67, %c0_68] : memref<128x512xbf16, #tpu.memory_space<vmem>>, vector<128x512xbf16>
    %cst_69 = arith.constant dense<0.000000e+00> : vector<2x512xf32>
    %166 = tpu.matmul %164, %165, %cst_69 {dimension_numbers = #tpu.dot_dimension_numbers<[1], [0], [0], [1], [0, 0, 1, 1], [], []>} : vector<2x128xbf16>, vector<128x512xbf16>, vector<2x512xf32> -> vector<2x512xf32>
    %167 = arith.addf %163, %166 : vector<2x512xf32>
    %168 = vector.extract_strided_slice %167 {offsets = [0, 0], sizes = [2, 384], strides = [1, 1]} : vector<2x512xf32> to vector<2x384xf32>
    %cst_70 = arith.constant 5.000000e-01 : f32
    %169 = vector.broadcast %cst_70 : f32 to vector<2x384xf32>
    %170 = arith.mulf %169, %168 : vector<2x384xf32>
    %171 = math.tanh %170 : vector<2x384xf32>
    %cst_71 = arith.constant 1.000000e+00 : f32
    %172 = vector.broadcast %cst_71 : f32 to vector<2x384xf32>
    %173 = arith.addf %171, %172 : vector<2x384xf32>
    %cst_72 = arith.constant 5.000000e-01 : f32
    %174 = vector.broadcast %cst_72 : f32 to vector<2x384xf32>
    %175 = arith.mulf %174, %173 : vector<2x384xf32>
    %176 = vector.extract_strided_slice %175 {offsets = [0, 0], sizes = [2, 128], strides = [1, 1]} : vector<2x384xf32> to vector<2x128xf32>
    %177 = vector.extract_strided_slice %175 {offsets = [0, 128], sizes = [2, 128], strides = [1, 1]} : vector<2x384xf32> to vector<2x128xf32>
    %178 = vector.extract_strided_slice %175 {offsets = [0, 256], sizes = [2, 128], strides = [1, 1]} : vector<2x384xf32> to vector<2x128xf32>
    %179 = vector.extract_strided_slice %167 {offsets = [0, 384], sizes = [2, 128], strides = [1, 1]} : vector<2x512xf32> to vector<2x128xf32>
    %180 = math.tanh %179 : vector<2x128xf32>
    %181 = arith.mulf %177, %159 : vector<2x128xf32>
    %182 = arith.mulf %176, %180 : vector<2x128xf32>
    %183 = arith.addf %181, %182 : vector<2x128xf32>
    %184 = math.tanh %183 : vector<2x128xf32>
    %185 = arith.mulf %178, %184 : vector<2x128xf32>
    %c0_73 = arith.constant 0 : index
    %c7 = arith.constant 7 : index
    %c0_74 = arith.constant 0 : index
    %186 = vector.load %arg11[%c0_73, %c7, %c0_74] : memref<2x8x512xf32, #tpu.memory_space<vmem>>, vector<2x1x512xf32>
    %187 = vector.shape_cast %186 : vector<2x1x512xf32> to vector<2x512xf32>
    %188 = arith.truncf %185 : vector<2x128xf32> to vector<2x128xbf16>
    %c0_75 = arith.constant 0 : index
    %c0_76 = arith.constant 0 : index
    %189 = vector.load %arg4[%c0_75, %c0_76] : memref<128x512xbf16, #tpu.memory_space<vmem>>, vector<128x512xbf16>
    %cst_77 = arith.constant dense<0.000000e+00> : vector<2x512xf32>
    %190 = tpu.matmul %188, %189, %cst_77 {dimension_numbers = #tpu.dot_dimension_numbers<[1], [0], [0], [1], [0, 0, 1, 1], [], []>} : vector<2x128xbf16>, vector<128x512xbf16>, vector<2x512xf32> -> vector<2x512xf32>
    %191 = arith.addf %187, %190 : vector<2x512xf32>
    %192 = vector.extract_strided_slice %191 {offsets = [0, 0], sizes = [2, 384], strides = [1, 1]} : vector<2x512xf32> to vector<2x384xf32>
    %cst_78 = arith.constant 5.000000e-01 : f32
    %193 = vector.broadcast %cst_78 : f32 to vector<2x384xf32>
    %194 = arith.mulf %193, %192 : vector<2x384xf32>
    %195 = math.tanh %194 : vector<2x384xf32>
    %cst_79 = arith.constant 1.000000e+00 : f32
    %196 = vector.broadcast %cst_79 : f32 to vector<2x384xf32>
    %197 = arith.addf %195, %196 : vector<2x384xf32>
    %cst_80 = arith.constant 5.000000e-01 : f32
    %198 = vector.broadcast %cst_80 : f32 to vector<2x384xf32>
    %199 = arith.mulf %198, %197 : vector<2x384xf32>
    %200 = vector.extract_strided_slice %199 {offsets = [0, 0], sizes = [2, 128], strides = [1, 1]} : vector<2x384xf32> to vector<2x128xf32>
    %201 = vector.extract_strided_slice %199 {offsets = [0, 128], sizes = [2, 128], strides = [1, 1]} : vector<2x384xf32> to vector<2x128xf32>
    %202 = vector.extract_strided_slice %199 {offsets = [0, 256], sizes = [2, 128], strides = [1, 1]} : vector<2x384xf32> to vector<2x128xf32>
    %203 = vector.extract_strided_slice %191 {offsets = [0, 384], sizes = [2, 128], strides = [1, 1]} : vector<2x512xf32> to vector<2x128xf32>
    %204 = math.tanh %203 : vector<2x128xf32>
    %205 = arith.mulf %201, %183 : vector<2x128xf32>
    %206 = arith.mulf %200, %204 : vector<2x128xf32>
    %207 = arith.addf %205, %206 : vector<2x128xf32>
    %208 = math.tanh %207 : vector<2x128xf32>
    %209 = arith.mulf %202, %208 : vector<2x128xf32>
    %c0_81 = arith.constant 0 : index
    %c0_82 = arith.constant 0 : index
    %210 = vector.load %arg9[%c0_81, %c0_82] : memref<2x128xf32, #tpu.memory_space<vmem>>, vector<2x128xf32>
    tpu.vector_store %arg9[%c0_81, %c0_82], %209 {strides = array<i32>} : memref<2x128xf32, #tpu.memory_space<vmem>>, vector<2x128xf32>,
    %c0_83 = arith.constant 0 : index
    %c0_84 = arith.constant 0 : index
    %211 = vector.load %arg10[%c0_83, %c0_84] : memref<2x128xf32, #tpu.memory_space<vmem>>, vector<2x128xf32>
    tpu.vector_store %arg10[%c0_83, %c0_84], %207 {strides = array<i32>} : memref<2x128xf32, #tpu.memory_space<vmem>>, vector<2x128xf32>,
    %212 = arith.truncf %207 : vector<2x128xf32> to vector<2x128xbf16>
    %c0_85 = arith.constant 0 : index
    %c0_86 = arith.constant 0 : index
    %213 = vector.load %arg6[%c0_85, %c0_86] : memref<128x128xbf16, #tpu.memory_space<vmem>>, vector<128x128xbf16>
    %cst_87 = arith.constant dense<0.000000e+00> : vector<2x128xf32>
    %214 = tpu.matmul %212, %213, %cst_87 {dimension_numbers = #tpu.dot_dimension_numbers<[1], [0], [0], [1], [0, 0, 1, 1], [], []>} : vector<2x128xbf16>, vector<128x128xbf16>, vector<2x128xf32> -> vector<2x128xf32>
    %c0_88 = arith.constant 0 : index
    %c0_89 = arith.constant 0 : index
    %215 = vector.load %arg7[%c0_88, %c0_89] : memref<1x128xf32, #tpu.memory_space<vmem>>, vector<1x128xf32>
    %216 = vector.broadcast %215 : vector<1x128xf32> to vector<2x128xf32>
    %217 = arith.addf %214, %216 : vector<2x128xf32>
    %c0_90 = arith.constant 0 : index
    %c0_91 = arith.constant 0 : index
    %218 = vector.load %arg8[%c0_90, %c0_91] : memref<2x128xf32, #tpu.memory_space<vmem>>, vector<2x128xf32>
    tpu.vector_store %arg8[%c0_90, %c0_91], %217 {strides = array<i32>} : memref<2x128xf32, #tpu.memory_space<vmem>>, vector<2x128xf32>,
    return
  }
}

</mosaic_0001>

<bundles_post_ra>
// kernel: lili_encoder.1
= control target key start
LH: loop header
LB: loop body
LE: loop exit
PB: predicated region body
PF: predicated region fallthrough
CT: control target
= control target key end

     0   :  { %v2212_v1 = vmov 0   ;;  %vm82_vm0 = vcmask 130048   ;;  %v42_v42 = vlaneseq  ;;  %vm573_vm1 = vcmask 1041409   ;;  %s3032_s3 = inlined_call_operand.vmem [shape: bf16[16,512], index: 3, kind: input, shape index: {}]   ;;  %s3033_s0 = inlined_call_operand.vmem [shape: f32[2,8,16], index: 0, kind: input, shape index: {}]   ;;  %s3034_s4 = inlined_call_operand.vmem [shape: bf16[128,512], index: 4, kind: input, shape index: {}]   ;;  %s3035_s1 = inlined_call_operand.vmem [shape: f32[2,128], index: 1, kind: input, shape index: {}]   ;;  %s3036_s5 = inlined_call_operand.vmem [shape: f32[1,512], index: 5, kind: input, shape index: {}]   ;;  %s3037_s2 = inlined_call_operand.vmem [shape: f32[2,128], index: 2, kind: input, shape index: {}]   ;;  %s3038_s6 = inlined_call_operand.vmem [shape: bf16[128,128], index: 6, kind: input, shape index: {}]   ;;  %s3039_s10 = inlined_call_operand.vmem [shape: f32[2,128], index: 10, kind: output, shape index: {2}]   ;;  %s3040_s9 = inlined_call_operand.vmem [shape: f32[2,128], index: 9, kind: output, shape index: {1}]   ;;  %s3041_s7 = inlined_call_operand.vmem [shape: f32[1,128], index: 7, kind: input, shape index: {}]   ;;  %s3042_s8 = inlined_call_operand.vmem [shape: f32[2,128], index: 8, kind: output, shape index: {0}]  }
   0x1   :  { %v2022_v0 = vld [vmem:[%s3032_s3 + $0x4] ss:$16 sps:$4 sm:$0xff]   ;;  %118 = vmatprep.mubr.bf16.mxu1 %v2212_v1  ;;  %411 = vmatprep.mubr.bf16.mxu0 %v2212_v1  ;;  %v2024_v2 = vld [vmem:[%s3032_s3] ss:$16 sps:$4 sm:$0xff]   ;;  %v34_v4 = vld [vmem:[%s3033_s0 + $0x8] sm:$0xff]  ;;  %vm2215_vm2 = vmmov 0  }
   0x2   :  { %v33_v3 = vld [vmem:[%s3033_s0] sm:$0xff]  ;;  %100 = vmatprep.subr.bf16.mxu1 %v2022_v0  ;;  %v2025_v6 = vld [vmem:[%s3032_s3 + $0x8] ss:$16 sps:$4 sm:$0xff]   ;;  %v2027_v7 = vld [vmem:[%s3032_s3 + $0xc] ss:$16 sps:$4 sm:$0xff]   ;;  %v43_v43 = vshrl.u32 %v42_v42, 7 }
   0x3   :  { %v35_v5 = vpack.c.bf16 %v34_v4, %v33_v3  ;;  %101 = vmatpush1.bf16.msra.mxu1 %v2024_v2  ;;  %v2294_v8 = vld [vmem:[%s3034_s4 + $0xe4] ss:$16 sps:$4 sm:$0xff]   ;;  %v2299_v9 = vld [vmem:[%s3034_s4 + $0xe0] ss:$16 sps:$4 sm:$0xff]   ;;  %v2311_v11 = vld [vmem:[%s3034_s4 + $0xec] ss:$16 sps:$4 sm:$0xff]  }
   0x4   :  { %143 = vmatprep.subr.bf16.mxu1 %v2027_v7  ;;  %v2304_v10 = vld [vmem:[%s3034_s4 + $0xc4] ss:$16 sps:$4 sm:$0xff]   ;;  %379 = vmatprep.subr.bf16.mxu0 %v2294_v8  ;;  %v2317_v12 = vld [vmem:[%s3034_s4 + $0xc0] ss:$16 sps:$4 sm:$0xff]   ;;  %v2330_v14 = vld [vmem:[%s3034_s4 + $0xe8] ss:$16 sps:$4 sm:$0xff]  }
   0x5   :  { %380 = vmatpush1.bf16.msra.mxu0 %v2299_v9  ;;  %v2324_v13 = vld [vmem:[%s3034_s4 + $0xa4] ss:$16 sps:$4 sm:$0xff]   ;;  %v2336_v15 = vld [vmem:[%s3034_s4 + $0xa0] ss:$16 sps:$4 sm:$0xff]   ;;  %v2342_v16 = vld [vmem:[%s3034_s4 + $0xcc] ss:$16 sps:$4 sm:$0xff]  }
   0x6   :  { %1943 = vmatmul.mubr.msk.bf16.vlgmr.msra.gmra.mxu1 %vm82_vm0, %v35_v5  ;;  %381 = vmatprep.subr.bf16.mxu0 %v2304_v10  ;;  %v2347_v17 = vld [vmem:[%s3034_s4 + $0x84] ss:$16 sps:$4 sm:$0xff]   ;;  %v2353_v18 = vld [vmem:[%s3034_s4 + $0xc8] ss:$16 sps:$4 sm:$0xff]   ;;  %v2360_v19 = vld [vmem:[%s3034_s4 + $0x80] ss:$16 sps:$4 sm:$0xff]  }
   0x7   :  { %144 = vmatpush1.bf16.msra.mxu1 %v2025_v6  ;;  %161 = vmatprep.mubr.bf16.mxu1 %v2212_v1  ;;  %v2367_v20 = vld [vmem:[%s3034_s4 + $0xac] ss:$16 sps:$4 sm:$0xff]   ;;  %v2372_v21 = vld [vmem:[%s3034_s4 + $0x64] ss:$16 sps:$4 sm:$0xff]   ;;  %v2378_v22 = vld [vmem:[%s3034_s4 + $0xa8] ss:$16 sps:$4 sm:$0xff]  }
   0x8   :  { %420 = vmatprep.subr.bf16.mxu1 %v2311_v11  ;;  %v2385_v23 = vld [vmem:[%s3034_s4 + $0x60] ss:$16 sps:$4 sm:$0xff]   ;;  %v2392_v24 = vld [vmem:[%s3034_s4 + $0x8c] ss:$16 sps:$4 sm:$0xff]   ;;  %v2397_v25 = vld [vmem:[%s3034_s4 + $0x44] ss:$16 sps:$4 sm:$0xff]  }
   0x9   :  { %382 = vmatpush1.bf16.msra.mxu0 %v2317_v12  ;;  %v2404_v26 = vld [vmem:[%s3034_s4 + $0x88] ss:$16 sps:$4 sm:$0xff]   ;;  %v2409_v27 = vld [vmem:[%s3034_s4 + $0x40] ss:$16 sps:$4 sm:$0xff]   ;;  %v2416_v28 = vld [vmem:[%s3034_s4 + $0x6c] ss:$16 sps:$4 sm:$0xff]  }
   0xa   :  { %383 = vmatprep.subr.bf16.mxu0 %v2324_v13  ;;  %v2421_v29 = vld [vmem:[%s3034_s4 + $0x24] ss:$16 sps:$4 sm:$0xff]   ;;  %v2428_v30 = vld [vmem:[%s3034_s4 + $0x68] ss:$16 sps:$4 sm:$0xff]   ;;  %v2433_v31 = vld [vmem:[%s3034_s4 + $0x20] ss:$16 sps:$4 sm:$0xff]  }
   0xb   :  { %v2440_v32 = vld [vmem:[%s3034_s4 + $0x4c] ss:$16 sps:$4 sm:$0xff]   ;;  %v2445_v33 = vld [vmem:[%s3034_s4 + $0x4] ss:$16 sps:$4 sm:$0xff]   ;;  %v2452_v34 = vld [vmem:[%s3034_s4 + $0x48] ss:$16 sps:$4 sm:$0xff]  }
   0xc   :  { %v2457_v35 = vld [vmem:[%s3034_s4] ss:$16 sps:$4 sm:$0xff]   ;;  %v2467_v37 = vld [vmem:[%s3034_s4 + $0x2c] ss:$16 sps:$4 sm:$0xff]   ;;  %v2474_v39 = vld [vmem:[%s3034_s4 + $0x28] ss:$16 sps:$4 sm:$0xff]  }
   0xd   :  { %384 = vmatpush1.bf16.msra.mxu0 %v2336_v15  ;;  %v181_v36 = vld [vmem:[%s3035_s1] sm:$0x3]  ;;  %v2480_v40 = vld [vmem:[%s3034_s4 + $0xc] ss:$16 sps:$4 sm:$0xff]   ;;  %v2487_v41 = vld [vmem:[%s3034_s4 + $0x8] ss:$16 sps:$4 sm:$0xff]  }
   0xe   :  { %1944 = vmatmul.mubr.msk.bf16.vlgmr.msra.gmra.mxu1 %vm82_vm0, %v35_v5  ;;  %385 = vmatprep.subr.bf16.mxu0 %v2347_v17  ;;  %v186_v38 = vpack.c.bf16 %v181_v36, %v181_v36  ;;  %v44_v44 = vsub.s32 0, %v43_v43  ;;  %v40_v45 = vld [vmem:[%s3036_s5] sm:$0xf]  ;;  %v48_v46 = vsub.s32 1, %v43_v43  ;;  %v52_v51 = vsub.s32 2, %v43_v43 }
   0xf   :  { %421 = vmatpush1.bf16.msra.mxu1 %v2330_v14  ;;  %452 = vmatprep.mubr.bf16.mxu1 %v2212_v1  ;;  %v56_v54 = vsub.s32 3, %v43_v43  ;;  %v2213_v7 = vmov 1966171168  }
  0x10   :  { %422 = vmatprep.subr.bf16.mxu1 %v2342_v16  ;;  %v45_v47 = vrot.slane %v40_v45, %v44_v44  ;;  %v49_v48 = vrot.slane %v40_v45, %v48_v46  ;;  %v53_v57 = vrot.slane %v40_v45, %v52_v51  ;;  %v468_v36 = vunpack.c.l.s4 %v2213_v7 }
  0x11   :  { %386 = vmatpush1.bf16.msra.mxu0 %v2360_v19  ;;  %v57_v60 = vrot.slane %v40_v45, %v56_v54 }
  0x12   :  { %387 = vmatprep.subr.bf16.mxu0 %v2372_v21  ;;  %v469_v44 = vunpack.c.0.s8 %v468_v36 }
  0x13   :  { %423 = vmatpush1.bf16.msra.mxu1 %v2353_v18 }
  0x14   :  { %424 = vmatprep.subr.bf16.mxu1 %v2367_v20 }
  0x15   :  { %388 = vmatpush1.bf16.msra.mxu0 %v2385_v23 }
  0x16   :  { %389 = vmatprep.subr.bf16.mxu0 %v2397_v25 }
  0x17   :  { %425 = vmatpush1.bf16.msra.mxu1 %v2378_v22 }
  0x18   :  { %426 = vmatprep.subr.bf16.mxu1 %v2392_v24 }
  0x19   :  { %390 = vmatpush1.bf16.msra.mxu0 %v2409_v27 }
  0x1a   :  { %391 = vmatprep.subr.bf16.mxu0 %v2421_v29 }
  0x1b   :  { %427 = vmatpush1.bf16.msra.mxu1 %v2404_v26 }
  0x1c   :  { %428 = vmatprep.subr.bf16.mxu1 %v2416_v28 }
  0x1d   :  { %392 = vmatpush1.bf16.msra.mxu0 %v2433_v31 }
  0x1e   :  { %393 = vmatprep.subr.bf16.mxu0 %v2445_v33 }
  0x1f   :  { %429 = vmatpush1.bf16.msra.mxu1 %v2428_v30 }
  0x20   :  { %430 = vmatprep.subr.bf16.mxu1 %v2440_v32 }
  0x21   :  { %394 = vmatpush1.bf16.msra.mxu0 %v2457_v35 }
  0x22   :  { %577 = vmatprep.subr.bf16.mxu0 %v2294_v8 }
  0x23   :  { %431 = vmatpush1.bf16.msra.mxu1 %v2452_v34 }
  0x24   :  { %432 = vmatprep.subr.bf16.mxu1 %v2467_v37  ;;  %412 = vmatmul.mubr.bf16.vlgmr.msra.gmra.mxu0 %v186_v38 }
  0x25   :  { %578 = vmatpush1.bf16.msra.mxu0 %v2299_v9  ;;  %609 = vmatprep.mubr.bf16.mxu0 %v2212_v1 }
  0x26   :  { %579 = vmatprep.subr.bf16.mxu0 %v2304_v10 }
  0x27   :  { %433 = vmatpush1.bf16.msra.mxu1 %v2474_v39 }
  0x28   :  { %434 = vmatprep.subr.bf16.mxu1 %v2480_v40 }
  0x29   :  { %580 = vmatpush1.bf16.msra.mxu0 %v2317_v12 }
  0x2a   :  { %581 = vmatprep.subr.bf16.mxu0 %v2324_v13 }
  0x2b   :  { %435 = vmatpush1.bf16.msra.mxu1 %v2487_v41 }
  0x2c   :  { %618 = vmatprep.subr.bf16.mxu1 %v2311_v11 }
  0x2d   :  { %582 = vmatpush1.bf16.msra.mxu0 %v2336_v15 }
  0x2e   :  { %453 = vmatmul.mubr.bf16.vlgmr.msra.gmra.mxu1 %v186_v38  ;;  %583 = vmatprep.subr.bf16.mxu0 %v2347_v17 }
  0x2f   :  { %619 = vmatpush1.bf16.msra.mxu1 %v2330_v14  ;;  %650 = vmatprep.mubr.bf16.mxu1 %v2212_v1 }
  0x30   :  { %620 = vmatprep.subr.bf16.mxu1 %v2342_v16 }
  0x31   :  { %584 = vmatpush1.bf16.msra.mxu0 %v2360_v19 }
  0x32   :  { %585 = vmatprep.subr.bf16.mxu0 %v2372_v21 }
  0x33   :  { %621 = vmatpush1.bf16.msra.mxu1 %v2353_v18 }
  0x34   :  { %622 = vmatprep.subr.bf16.mxu1 %v2367_v20 }
  0x35   :  { %586 = vmatpush1.bf16.msra.mxu0 %v2385_v23 }
  0x36   :  { %587 = vmatprep.subr.bf16.mxu0 %v2397_v25 }
  0x37   :  { %623 = vmatpush1.bf16.msra.mxu1 %v2378_v22 }
  0x38   :  { %624 = vmatprep.subr.bf16.mxu1 %v2392_v24 }
  0x39   :  { %588 = vmatpush1.bf16.msra.mxu0 %v2409_v27 }
  0x3a   :  { %589 = vmatprep.subr.bf16.mxu0 %v2421_v29 }
  0x3b   :  { %625 = vmatpush1.bf16.msra.mxu1 %v2404_v26 }
  0x3c   :  { %626 = vmatprep.subr.bf16.mxu1 %v2416_v28 }
  0x3d   :  { %590 = vmatpush1.bf16.msra.mxu0 %v2433_v31 }
  0x3e   :  { %591 = vmatprep.subr.bf16.mxu0 %v2445_v33 }
  0x3f   :  { %627 = vmatpush1.bf16.msra.mxu1 %v2428_v30 }
  0x40   :  { %628 = vmatprep.subr.bf16.mxu1 %v2440_v32 }
  0x41   :  { %592 = vmatpush1.bf16.msra.mxu0 %v2457_v35 }
  0x42   :  { %749 = vmatprep.subr.bf16.mxu0 %v2294_v8 }
  0x43   :  { %629 = vmatpush1.bf16.msra.mxu1 %v2452_v34 }
  0x44   :  { %630 = vmatprep.subr.bf16.mxu1 %v2467_v37 }
  0x47   :  { %631 = vmatpush1.bf16.msra.mxu1 %v2474_v39 }
  0x48   :  { %632 = vmatprep.subr.bf16.mxu1 %v2480_v40 }
  0x4b   :  { %633 = vmatpush1.bf16.msra.mxu1 %v2487_v41 }
  0x4c   :  { %790 = vmatprep.subr.bf16.mxu1 %v2311_v11 }
  0xc6   :  { %v120_v49 = vpop.f32.mrf.mxu1 }
  0xc7   :  { %v121_v50 = vadd.f32 %v120_v49, %v45_v47 }
  0xc8   :  { %v122_v52 = vpop.f32.mrf.mxu1 }
  0xc9   :  { %172 = vst [vmem:[#allocation2] sm:$0xff] %v121_v50  ;;  %v123_v53 = vadd.f32 %v122_v52, %v49_v48 }
  0xca   :  { %v124_v55 = vpop.f32.mrf.mxu1 }
  0xcb   :  { %173 = vst [vmem:[#allocation2 + $0x8] sm:$0xff] %v123_v53  ;;  %v125_v56 = vadd.f32 %v124_v55, %v45_v47  ;;  %v2529_v47 = vsub.s32 %v469_v44, %v43_v43 }
  0xcc   :  { %v126_v58 = vpop.f32.mrf.mxu1 }
  0xcd   :  { %177 = vst [vmem:[#allocation2 + $0x20] sm:$0xff] %v125_v56  ;;  %v127_v59 = vadd.f32 %v126_v58, %v49_v48 }
  0xce   :  { %v163_v61 = vpop.f32.mrf.mxu1 }
  0xcf   :  { %178 = vst [vmem:[#allocation2 + $0x28] sm:$0xff] %v127_v59  ;;  %v164_v62 = vadd.f32 %v163_v61, %v53_v57 }
  0xd0   :  { %v165_v63 = vpop.f32.mrf.mxu1 }
  0xd1   :  { %174 = vst [vmem:[#allocation2 + $0x10] sm:$0xff] %v164_v62  ;;  %v166_v0 = vadd.f32 %v165_v63, %v57_v60 }
  0xd2   :  { %v167_v2 = vpop.f32.mrf.mxu1 }
  0xd3   :  { %175 = vst [vmem:[#allocation2 + $0x18] sm:$0xff] %v166_v0  ;;  %v168_v3 = vadd.f32 %v167_v2, %v53_v57 }
  0xd4   :  { %v169_v4 = vpop.f32.mrf.mxu1 }
  0xd5   :  { %179 = vst [vmem:[#allocation2 + $0x30] sm:$0xff] %v168_v3  ;;  %v170_v5 = vadd.f32 %v169_v4, %v57_v60  ;;  %v1977_v3 = vld.sshfl [vmem:[%s3037_s2] sm:$0x11 pattern:$0x75316420] }
  0xd7   :  { %180 = vst [vmem:[#allocation2 + $0x38] sm:$0xff] %v170_v5  ;;  %v531_v5 = vcombine.high %v1977_v3, %v1977_v3 }
  0xda   :  { %v183_v59 = vld [vmem:[#allocation2] ss:$8 sm:$0xf] }
  0xde   :  { %v185_v60 = vld [vmem:[#allocation2 + $0x20] ss:$8 sm:$0xf] }
  0xe4   :  { %v413_v6 = vpop.f32.mrf.mxu0 }
  0xe6   :  { %v415_v38 = vpop.f32.mrf.mxu0 }
  0xe7   :  { %v465_v48 = vcombine.low %v413_v6, %v415_v38 }
  0xe8   :  { %v417_v42 = vpop.f32.mrf.mxu0 }
  0xe9   :  { %v473_v52 = vrot.slane %v465_v48, %v2529_v47  ;;  %v538_v42 = vrot.slane %v1977_v3, %v2529_v47 }
  0xea   :  { %v418_v45 = vpop.f32.mrf.mxu0 }
  0xeb   :  { %v545_v45 = vrot.slane %v531_v5, %v2529_v47 }
  0xee   :  { %v454_v46 = vpop.f32.mrf.mxu1 }
  0xf0   :  { %v456_v49 = vpop.f32.mrf.mxu1 }
  0xf1   :  { %v466_v50 = vcombine.low %v454_v46, %v456_v49 }
  0xf2   :  { %v458_v51 = vpop.f32.mrf.mxu1 }
  0xf3   :  { %v480_v53 = vrot.slane %v466_v50, %v2529_v47 }
  0xf4   :  { %v459_v54 = vpop.f32.mrf.mxu1 }
  0xf5   :  { %v481_v55 = vcombine.low %v473_v52, %v480_v53  ;;  %v482_v56 = vcombine.high %v473_v52, %v480_v53 }
  0xf7   :  { %v489_v57 = vrot.slane %v481_v55, %v2529_v47  ;;  %v496_v58 = vrot.slane %v482_v56, %v2529_v47 }
  0xf9   :  { %v499_v61 = vadd.f32 %v489_v57, %v183_v59  ;;  %v500_v43 = vadd.f32 %v496_v58, %v185_v60 }
  0xfb   :  { %v501_v62 = vmul.f32 0.5, %v499_v61  ;;  %v502_v63 = vmul.f32 0.5, %v500_v43  ;;  %v511_v0 = vrot.slane %v499_v61, 3  ;;  %v512_v2 = vrot.slane %v500_v43, 3 }
  0xfd   :  { %2084 = vtanh.f32 %v501_v62 }
  0xfe   :  { %2086 = vtanh.f32 %v502_v63 }
  0xff   :  { %2088 = vtanh.f32 %v511_v0 }
 0x100   :  { %2090 = vtanh.f32 %v512_v2 }
 0x10a   :  { %v2085_v4 = vpop.eup %2084 }
 0x10b   :  { %v2087_v6 = vpop.eup %2086  ;;  %v505_v7 = vadd.f32 1.0, %v2085_v4 }
 0x10c   :  { %v506_v36 = vadd.f32 1.0, %v2087_v6  ;;  %v2089_v48 = vpop.eup %2088 }
 0x10d   :  { %v507_v38 = vmul.f32 0.5, %v505_v7  ;;  %v2091_v50 = vpop.eup %2090 }
 0x10e   :  { %v508_v44 = vmul.f32 0.5, %v506_v36 }
 0x10f   :  { %v519_v46 = vrot.slane %v507_v38, 1  ;;  %v550_v52 = vmul.f32 %v2089_v48, %v507_v38  ;;  %v556_v57 = vrot.slane %v507_v38, 2 }
 0x110   :  { %v520_v49 = vrot.slane %v508_v44, 1  ;;  %v551_v54 = vmul.f32 %v2091_v50, %v508_v44  ;;  %v557_v59 = vrot.slane %v508_v44, 2 }
 0x111   :  { %v548_v51 = vmul.f32 %v538_v42, %v519_v46 }
 0x112   :  { %v549_v53 = vmul.f32 %v545_v45, %v520_v49 }
 0x113   :  { %v2540_v55 = vadd.f32 %v550_v52, %v548_v51 }
 0x114   :  { %v2542_v56 = vadd.f32 %v551_v54, %v549_v53 }
 0x115   :  { %2092 = vtanh.f32 %v2540_v55 }
 0x116   :  { %2094 = vtanh.f32 %v2542_v56 }
 0x122   :  { %v2093_v58 = vpop.eup %2092 }
 0x123   :  { %v2095_v60 = vpop.eup %2094  ;;  %v560_v61 = vmul.f32 %v2093_v58, %v556_v57  ;;  %v563_v58 = vld [vmem:[#allocation2 + $0x1] ss:$8 sm:$0xf] }
 0x124   :  { %v561_v43 = vmul.f32 %v2095_v60, %v557_v59  ;;  %v565_v59 = vld [vmem:[#allocation2 + $0x21] ss:$8 sm:$0xf] }
 0x125   :  { %v566_v62 = vpack.c.bf16 %v560_v61, %v560_v61 }
 0x126   :  { %v567_v63 = vpack.c.bf16 %v561_v43, %v561_v43 }
 0x127   :  { %v570_v2 = vunpack.c.l.b16 %v566_v62 }
 0x128   :  { %v571_v0 = vunpack.c.l.b16 %v567_v63 }
 0x12a   :  { %v572_v3 = vrot.slane %v571_v0, 7 }
 0x12c   :  { %v574_v4 = vsel %vm573_vm1, %v572_v3, %v570_v2 }
 0x12d   :  { %v575_v5 = vpack.c.b16 %v574_v4, %v574_v4 }
 0x12f   :  { %610 = vmatmul.mubr.bf16.vlgmr.msra.gmra.mxu0 %v575_v5  ;;  %651 = vmatmul.mubr.bf16.vlgmr.msra.gmra.mxu1 %v575_v5 }
 0x130   :  { %750 = vmatpush1.bf16.msra.mxu0 %v2299_v9  ;;  %791 = vmatpush1.bf16.msra.mxu1 %v2330_v14 }
 0x131   :  { %751 = vmatprep.subr.bf16.mxu0 %v2304_v10  ;;  %792 = vmatprep.subr.bf16.mxu1 %v2342_v16 }
 0x132   :  { %781 = vmatprep.mubr.bf16.mxu0 %v2212_v1  ;;  %822 = vmatprep.mubr.bf16.mxu1 %v2212_v1 }
 0x134   :  { %752 = vmatpush1.bf16.msra.mxu0 %v2317_v12  ;;  %793 = vmatpush1.bf16.msra.mxu1 %v2353_v18 }
 0x135   :  { %753 = vmatprep.subr.bf16.mxu0 %v2324_v13  ;;  %794 = vmatprep.subr.bf16.mxu1 %v2367_v20 }
 0x138   :  { %754 = vmatpush1.bf16.msra.mxu0 %v2336_v15  ;;  %795 = vmatpush1.bf16.msra.mxu1 %v2378_v22 }
 0x139   :  { %755 = vmatprep.subr.bf16.mxu0 %v2347_v17  ;;  %796 = vmatprep.subr.bf16.mxu1 %v2392_v24 }
 0x13c   :  { %756 = vmatpush1.bf16.msra.mxu0 %v2360_v19  ;;  %797 = vmatpush1.bf16.msra.mxu1 %v2404_v26 }
 0x13d   :  { %757 = vmatprep.subr.bf16.mxu0 %v2372_v21  ;;  %798 = vmatprep.subr.bf16.mxu1 %v2416_v28 }
 0x140   :  { %758 = vmatpush1.bf16.msra.mxu0 %v2385_v23  ;;  %799 = vmatpush1.bf16.msra.mxu1 %v2428_v30 }
 0x141   :  { %759 = vmatprep.subr.bf16.mxu0 %v2397_v25  ;;  %800 = vmatprep.subr.bf16.mxu1 %v2440_v32 }
 0x144   :  { %760 = vmatpush1.bf16.msra.mxu0 %v2409_v27  ;;  %801 = vmatpush1.bf16.msra.mxu1 %v2452_v34 }
 0x145   :  { %761 = vmatprep.subr.bf16.mxu0 %v2421_v29  ;;  %802 = vmatprep.subr.bf16.mxu1 %v2467_v37 }
 0x148   :  { %762 = vmatpush1.bf16.msra.mxu0 %v2433_v31  ;;  %803 = vmatpush1.bf16.msra.mxu1 %v2474_v39 }
 0x149   :  { %763 = vmatprep.subr.bf16.mxu0 %v2445_v33  ;;  %804 = vmatprep.subr.bf16.mxu1 %v2480_v40 }
 0x14c   :  { %764 = vmatpush1.bf16.msra.mxu0 %v2457_v35  ;;  %805 = vmatpush1.bf16.msra.mxu1 %v2487_v41 }
 0x14d   :  { %921 = vmatprep.subr.bf16.mxu0 %v2294_v8  ;;  %962 = vmatprep.subr.bf16.mxu1 %v2311_v11 }
 0x1ef   :  { %v611_v6 = vpop.f32.mrf.mxu0  ;;  %v652_v7 = vpop.f32.mrf.mxu1 }
 0x1f1   :  { %v613_v36 = vpop.f32.mrf.mxu0  ;;  %v654_v38 = vpop.f32.mrf.mxu1 }
 0x1f2   :  { %v663_v42 = vcombine.low %v611_v6, %v613_v36  ;;  %v664_v44 = vcombine.low %v652_v7, %v654_v38 }
 0x1f3   :  { %v615_v45 = vpop.f32.mrf.mxu0  ;;  %v656_v46 = vpop.f32.mrf.mxu1 }
 0x1f4   :  { %v671_v48 = vrot.slane %v663_v42, %v2529_v47  ;;  %v678_v49 = vrot.slane %v664_v44, %v2529_v47 }
 0x1f5   :  { %v616_v50 = vpop.f32.mrf.mxu0  ;;  %v657_v51 = vpop.f32.mrf.mxu1 }
 0x1f6   :  { %v679_v52 = vcombine.low %v671_v48, %v678_v49  ;;  %v680_v53 = vcombine.high %v671_v48, %v678_v49 }
 0x1f8   :  { %v687_v54 = vrot.slane %v679_v52, %v2529_v47  ;;  %v694_v57 = vrot.slane %v680_v53, %v2529_v47 }
 0x1fa   :  { %v697_v60 = vadd.f32 %v687_v54, %v563_v58  ;;  %v698_v61 = vadd.f32 %v694_v57, %v565_v59 }
 0x1fc   :  { %v699_v43 = vmul.f32 0.5, %v697_v60  ;;  %v700_v62 = vmul.f32 0.5, %v698_v61  ;;  %v709_v63 = vrot.slane %v697_v60, 3  ;;  %v710_v0 = vrot.slane %v698_v61, 3 }
 0x1fe   :  { %2096 = vtanh.f32 %v699_v43 }
 0x1ff   :  { %2098 = vtanh.f32 %v700_v62 }
 0x200   :  { %2100 = vtanh.f32 %v709_v63 }
 0x201   :  { %2102 = vtanh.f32 %v710_v0 }
 0x20b   :  { %v2097_v2 = vpop.eup %2096 }
 0x20c   :  { %v2099_v3 = vpop.eup %2098  ;;  %v703_v4 = vadd.f32 1.0, %v2097_v2 }
 0x20d   :  { %v704_v5 = vadd.f32 1.0, %v2099_v3  ;;  %v2101_v38 = vpop.eup %2100 }
 0x20e   :  { %v705_v6 = vmul.f32 0.5, %v703_v4  ;;  %v2103_v44 = vpop.eup %2102 }
 0x20f   :  { %v706_v7 = vmul.f32 0.5, %v704_v5 }
 0x210   :  { %v717_v36 = vrot.slane %v705_v6, 1  ;;  %v723_v46 = vmul.f32 %v2101_v38, %v705_v6  ;;  %v729_v52 = vrot.slane %v705_v6, 2 }
 0x211   :  { %v718_v42 = vrot.slane %v706_v7, 1  ;;  %v724_v49 = vmul.f32 %v2103_v44, %v706_v7  ;;  %v730_v54 = vrot.slane %v706_v7, 2 }
 0x212   :  { %v721_v45 = vmul.f32 %v717_v36, %v2540_v55 }
 0x213   :  { %v722_v48 = vmul.f32 %v718_v42, %v2542_v56 }
 0x214   :  { %v2587_v50 = vadd.f32 %v723_v46, %v721_v45 }
 0x215   :  { %v2589_v51 = vadd.f32 %v724_v49, %v722_v48 }
 0x216   :  { %2104 = vtanh.f32 %v2587_v50 }
 0x217   :  { %2106 = vtanh.f32 %v2589_v51 }
 0x223   :  { %v2105_v53 = vpop.eup %2104 }
 0x224   :  { %v2107_v57 = vpop.eup %2106  ;;  %v733_v58 = vmul.f32 %v2105_v53, %v729_v52  ;;  %v736_v53 = vld [vmem:[#allocation2 + $0x2] ss:$8 sm:$0xf] }
 0x225   :  { %v734_v59 = vmul.f32 %v2107_v57, %v730_v54  ;;  %v738_v54 = vld [vmem:[#allocation2 + $0x22] ss:$8 sm:$0xf] }
 0x226   :  { %v739_v60 = vpack.c.bf16 %v733_v58, %v733_v58 }
 0x227   :  { %v740_v55 = vpack.c.bf16 %v734_v59, %v734_v59 }
 0x228   :  { %v743_v43 = vunpack.c.l.b16 %v739_v60 }
 0x229   :  { %v744_v61 = vunpack.c.l.b16 %v740_v55 }
 0x22b   :  { %v745_v56 = vrot.slane %v744_v61, 7 }
 0x22d   :  { %v746_v62 = vsel %vm573_vm1, %v745_v56, %v743_v43 }
 0x22e   :  { %v747_v63 = vpack.c.b16 %v746_v62, %v746_v62 }
 0x230   :  { %782 = vmatmul.mubr.bf16.vlgmr.msra.gmra.mxu0 %v747_v63  ;;  %823 = vmatmul.mubr.bf16.vlgmr.msra.gmra.mxu1 %v747_v63 }
 0x231   :  { %922 = vmatpush1.bf16.msra.mxu0 %v2299_v9  ;;  %963 = vmatpush1.bf16.msra.mxu1 %v2330_v14 }
 0x232   :  { %923 = vmatprep.subr.bf16.mxu0 %v2304_v10  ;;  %964 = vmatprep.subr.bf16.mxu1 %v2342_v16 }
 0x233   :  { %953 = vmatprep.mubr.bf16.mxu0 %v2212_v1  ;;  %994 = vmatprep.mubr.bf16.mxu1 %v2212_v1 }
 0x235   :  { %924 = vmatpush1.bf16.msra.mxu0 %v2317_v12  ;;  %965 = vmatpush1.bf16.msra.mxu1 %v2353_v18 }
 0x236   :  { %925 = vmatprep.subr.bf16.mxu0 %v2324_v13  ;;  %966 = vmatprep.subr.bf16.mxu1 %v2367_v20 }
 0x239   :  { %926 = vmatpush1.bf16.msra.mxu0 %v2336_v15  ;;  %967 = vmatpush1.bf16.msra.mxu1 %v2378_v22 }
 0x23a   :  { %927 = vmatprep.subr.bf16.mxu0 %v2347_v17  ;;  %968 = vmatprep.subr.bf16.mxu1 %v2392_v24 }
 0x23d   :  { %928 = vmatpush1.bf16.msra.mxu0 %v2360_v19  ;;  %969 = vmatpush1.bf16.msra.mxu1 %v2404_v26 }
 0x23e   :  { %929 = vmatprep.subr.bf16.mxu0 %v2372_v21  ;;  %970 = vmatprep.subr.bf16.mxu1 %v2416_v28 }
 0x241   :  { %930 = vmatpush1.bf16.msra.mxu0 %v2385_v23  ;;  %971 = vmatpush1.bf16.msra.mxu1 %v2428_v30 }
 0x242   :  { %931 = vmatprep.subr.bf16.mxu0 %v2397_v25  ;;  %972 = vmatprep.subr.bf16.mxu1 %v2440_v32 }
 0x245   :  { %932 = vmatpush1.bf16.msra.mxu0 %v2409_v27  ;;  %973 = vmatpush1.bf16.msra.mxu1 %v2452_v34 }
 0x246   :  { %933 = vmatprep.subr.bf16.mxu0 %v2421_v29  ;;  %974 = vmatprep.subr.bf16.mxu1 %v2467_v37 }
 0x249   :  { %934 = vmatpush1.bf16.msra.mxu0 %v2433_v31  ;;  %975 = vmatpush1.bf16.msra.mxu1 %v2474_v39 }
 0x24a   :  { %935 = vmatprep.subr.bf16.mxu0 %v2445_v33  ;;  %976 = vmatprep.subr.bf16.mxu1 %v2480_v40 }
 0x24d   :  { %936 = vmatpush1.bf16.msra.mxu0 %v2457_v35  ;;  %977 = vmatpush1.bf16.msra.mxu1 %v2487_v41 }
 0x24e   :  { %1093 = vmatprep.subr.bf16.mxu0 %v2294_v8  ;;  %1134 = vmatprep.subr.bf16.mxu1 %v2311_v11 }
 0x2f0   :  { %v783_v0 = vpop.f32.mrf.mxu0  ;;  %v824_v2 = vpop.f32.mrf.mxu1 }
 0x2f2   :  { %v785_v3 = vpop.f32.mrf.mxu0  ;;  %v826_v4 = vpop.f32.mrf.mxu1 }
 0x2f3   :  { %v835_v5 = vcombine.low %v783_v0, %v785_v3  ;;  %v836_v6 = vcombine.low %v824_v2, %v826_v4 }
 0x2f4   :  { %v787_v7 = vpop.f32.mrf.mxu0  ;;  %v828_v36 = vpop.f32.mrf.mxu1 }
 0x2f5   :  { %v843_v38 = vrot.slane %v835_v5, %v2529_v47  ;;  %v850_v42 = vrot.slane %v836_v6, %v2529_v47 }
 0x2f6   :  { %v788_v44 = vpop.f32.mrf.mxu0  ;;  %v829_v45 = vpop.f32.mrf.mxu1 }
 0x2f7   :  { %v851_v46 = vcombine.low %v843_v38, %v850_v42  ;;  %v852_v48 = vcombine.high %v843_v38, %v850_v42 }
 0x2f9   :  { %v859_v49 = vrot.slane %v851_v46, %v2529_v47  ;;  %v866_v52 = vrot.slane %v852_v48, %v2529_v47 }
 0x2fb   :  { %v869_v57 = vadd.f32 %v859_v49, %v736_v53  ;;  %v870_v58 = vadd.f32 %v866_v52, %v738_v54 }
 0x2fd   :  { %v871_v59 = vmul.f32 0.5, %v869_v57  ;;  %v872_v60 = vmul.f32 0.5, %v870_v58  ;;  %v881_v55 = vrot.slane %v869_v57, 3  ;;  %v882_v61 = vrot.slane %v870_v58, 3 }
 0x2ff   :  { %2108 = vtanh.f32 %v871_v59 }
 0x300   :  { %2110 = vtanh.f32 %v872_v60 }
 0x301   :  { %2112 = vtanh.f32 %v881_v55 }
 0x302   :  { %2114 = vtanh.f32 %v882_v61 }
 0x30c   :  { %v2109_v43 = vpop.eup %2108 }
 0x30d   :  { %v2111_v56 = vpop.eup %2110  ;;  %v875_v62 = vadd.f32 1.0, %v2109_v43 }
 0x30e   :  { %v876_v63 = vadd.f32 1.0, %v2111_v56  ;;  %v2113_v4 = vpop.eup %2112 }
 0x30f   :  { %v877_v0 = vmul.f32 0.5, %v875_v62  ;;  %v2115_v6 = vpop.eup %2114 }
 0x310   :  { %v878_v2 = vmul.f32 0.5, %v876_v63 }
 0x311   :  { %v889_v3 = vrot.slane %v877_v0, 1  ;;  %v895_v36 = vmul.f32 %v2113_v4, %v877_v0  ;;  %v901_v46 = vrot.slane %v877_v0, 2  ;;  %v910_v4 = vld [vmem:[#allocation2 + $0x23] ss:$8 sm:$0xf] }
 0x312   :  { %v890_v5 = vrot.slane %v878_v2, 1  ;;  %v896_v42 = vmul.f32 %v2115_v6, %v878_v2  ;;  %v902_v49 = vrot.slane %v878_v2, 2 }
 0x313   :  { %v893_v7 = vmul.f32 %v889_v3, %v2587_v50  ;;  %v908_v3 = vld [vmem:[#allocation2 + $0x3] ss:$8 sm:$0xf] }
 0x314   :  { %v894_v38 = vmul.f32 %v890_v5, %v2589_v51 }
 0x315   :  { %v2634_v44 = vadd.f32 %v895_v36, %v893_v7 }
 0x316   :  { %v2636_v45 = vadd.f32 %v896_v42, %v894_v38 }
 0x317   :  { %2116 = vtanh.f32 %v2634_v44 }
 0x318   :  { %2118 = vtanh.f32 %v2636_v45 }
 0x324   :  { %v2117_v48 = vpop.eup %2116 }
 0x325   :  { %v2119_v52 = vpop.eup %2118  ;;  %v905_v53 = vmul.f32 %v2117_v48, %v901_v46 }
 0x326   :  { %v906_v54 = vmul.f32 %v2119_v52, %v902_v49 }
 0x327   :  { %v911_v57 = vpack.c.bf16 %v905_v53, %v905_v53 }
 0x328   :  { %v912_v50 = vpack.c.bf16 %v906_v54, %v906_v54 }
 0x329   :  { %v915_v59 = vunpack.c.l.b16 %v911_v57 }
 0x32a   :  { %v916_v58 = vunpack.c.l.b16 %v912_v50 }
 0x32c   :  { %v917_v51 = vrot.slane %v916_v58, 7 }
 0x32e   :  { %v918_v60 = vsel %vm573_vm1, %v917_v51, %v915_v59 }
 0x32f   :  { %v919_v55 = vpack.c.b16 %v918_v60, %v918_v60 }
 0x331   :  { %954 = vmatmul.mubr.bf16.vlgmr.msra.gmra.mxu0 %v919_v55  ;;  %995 = vmatmul.mubr.bf16.vlgmr.msra.gmra.mxu1 %v919_v55 }
 0x332   :  { %1094 = vmatpush1.bf16.msra.mxu0 %v2299_v9  ;;  %1135 = vmatpush1.bf16.msra.mxu1 %v2330_v14 }
 0x333   :  { %1095 = vmatprep.subr.bf16.mxu0 %v2304_v10  ;;  %1136 = vmatprep.subr.bf16.mxu1 %v2342_v16 }
 0x334   :  { %1125 = vmatprep.mubr.bf16.mxu0 %v2212_v1  ;;  %1166 = vmatprep.mubr.bf16.mxu1 %v2212_v1 }
 0x336   :  { %1096 = vmatpush1.bf16.msra.mxu0 %v2317_v12  ;;  %1137 = vmatpush1.bf16.msra.mxu1 %v2353_v18 }
 0x337   :  { %1097 = vmatprep.subr.bf16.mxu0 %v2324_v13  ;;  %1138 = vmatprep.subr.bf16.mxu1 %v2367_v20 }
 0x33a   :  { %1098 = vmatpush1.bf16.msra.mxu0 %v2336_v15  ;;  %1139 = vmatpush1.bf16.msra.mxu1 %v2378_v22 }
 0x33b   :  { %1099 = vmatprep.subr.bf16.mxu0 %v2347_v17  ;;  %1140 = vmatprep.subr.bf16.mxu1 %v2392_v24 }
 0x33e   :  { %1100 = vmatpush1.bf16.msra.mxu0 %v2360_v19  ;;  %1141 = vmatpush1.bf16.msra.mxu1 %v2404_v26 }
 0x33f   :  { %1101 = vmatprep.subr.bf16.mxu0 %v2372_v21  ;;  %1142 = vmatprep.subr.bf16.mxu1 %v2416_v28 }
 0x342   :  { %1102 = vmatpush1.bf16.msra.mxu0 %v2385_v23  ;;  %1143 = vmatpush1.bf16.msra.mxu1 %v2428_v30 }
 0x343   :  { %1103 = vmatprep.subr.bf16.mxu0 %v2397_v25  ;;  %1144 = vmatprep.subr.bf16.mxu1 %v2440_v32 }
 0x346   :  { %1104 = vmatpush1.bf16.msra.mxu0 %v2409_v27  ;;  %1145 = vmatpush1.bf16.msra.mxu1 %v2452_v34 }
 0x347   :  { %1105 = vmatprep.subr.bf16.mxu0 %v2421_v29  ;;  %1146 = vmatprep.subr.bf16.mxu1 %v2467_v37 }
 0x34a   :  { %1106 = vmatpush1.bf16.msra.mxu0 %v2433_v31  ;;  %1147 = vmatpush1.bf16.msra.mxu1 %v2474_v39 }
 0x34b   :  { %1107 = vmatprep.subr.bf16.mxu0 %v2445_v33  ;;  %1148 = vmatprep.subr.bf16.mxu1 %v2480_v40 }
 0x34e   :  { %1108 = vmatpush1.bf16.msra.mxu0 %v2457_v35  ;;  %1149 = vmatpush1.bf16.msra.mxu1 %v2487_v41 }
 0x34f   :  { %1265 = vmatprep.subr.bf16.mxu0 %v2294_v8  ;;  %1306 = vmatprep.subr.bf16.mxu1 %v2311_v11 }
 0x3f1   :  { %v955_v9 = vpop.f32.mrf.mxu0  ;;  %v996_v10 = vpop.f32.mrf.mxu1 }
 0x3f3   :  { %v957_v12 = vpop.f32.mrf.mxu0  ;;  %v998_v13 = vpop.f32.mrf.mxu1 }
 0x3f4   :  { %v1007_v14 = vcombine.low %v955_v9, %v957_v12  ;;  %v1008_v15 = vcombine.low %v996_v10, %v998_v13 }
 0x3f5   :  { %v959_v17 = vpop.f32.mrf.mxu0  ;;  %v1000_v61 = vpop.f32.mrf.mxu1 }
 0x3f6   :  { %v1015_v43 = vrot.slane %v1007_v14, %v2529_v47  ;;  %v1022_v56 = vrot.slane %v1008_v15, %v2529_v47 }
 0x3f7   :  { %v960_v62 = vpop.f32.mrf.mxu0  ;;  %v1001_v63 = vpop.f32.mrf.mxu1 }
 0x3f8   :  { %v1023_v0 = vcombine.low %v1015_v43, %v1022_v56  ;;  %v1024_v2 = vcombine.high %v1015_v43, %v1022_v56 }
 0x3fa   :  { %v1031_v8 = vrot.slane %v1023_v0, %v2529_v47  ;;  %v1038_v11 = vrot.slane %v1024_v2, %v2529_v47 }
 0x3fc   :  { %v1041_v5 = vadd.f32 %v1031_v8, %v908_v3  ;;  %v1042_v6 = vadd.f32 %v1038_v11, %v910_v4  ;;  %v2691_v8 = vld [vmem:[%s3034_s4 + $0xe0] ss:$16 sps:$4 sm:$0xff]   ;;  %v2697_v11 = vld [vmem:[%s3034_s4 + $0xe8] ss:$16 sps:$4 sm:$0xff]   ;;  %v2703_v3 = vld [vmem:[%s3034_s4 + $0xc4] ss:$16 sps:$4 sm:$0xff]  }
 0x3fd   :  { %v2712_v4 = vld [vmem:[%s3034_s4 + $0xc0] ss:$16 sps:$4 sm:$0xff]  }
 0x3fe   :  { %v1043_v7 = vmul.f32 0.5, %v1041_v5  ;;  %v1044_v36 = vmul.f32 0.5, %v1042_v6  ;;  %v1053_v38 = vrot.slane %v1041_v5, 3  ;;  %v1054_v42 = vrot.slane %v1042_v6, 3  ;;  %v2719_v5 = vld [vmem:[%s3034_s4 + $0xa4] ss:$16 sps:$4 sm:$0xff]  }
 0x400   :  { %2120 = vtanh.f32 %v1043_v7 }
 0x401   :  { %2122 = vtanh.f32 %v1044_v36 }
 0x402   :  { %2124 = vtanh.f32 %v1053_v38 }
 0x403   :  { %2126 = vtanh.f32 %v1054_v42 }
 0x40d   :  { %v2121_v46 = vpop.eup %2120 }
 0x40e   :  { %v2123_v48 = vpop.eup %2122  ;;  %v1047_v49 = vadd.f32 1.0, %v2121_v46 }
 0x40f   :  { %v1048_v52 = vadd.f32 1.0, %v2123_v48  ;;  %v2125_v50 = vpop.eup %2124 }
 0x410   :  { %v1049_v53 = vmul.f32 0.5, %v1047_v49  ;;  %v2127_v59 = vpop.eup %2126 }
 0x411   :  { %v1050_v54 = vmul.f32 0.5, %v1048_v52 }
 0x412   :  { %v1061_v57 = vrot.slane %v1049_v53, 1  ;;  %v1067_v60 = vmul.f32 %v2125_v50, %v1049_v53  ;;  %v1073_v13 = vrot.slane %v1049_v53, 2 }
 0x413   :  { %v1062_v58 = vrot.slane %v1050_v54, 1  ;;  %v1068_v9 = vmul.f32 %v2127_v59, %v1050_v54  ;;  %v1074_v15 = vrot.slane %v1050_v54, 2 }
 0x414   :  { %v1065_v51 = vmul.f32 %v1061_v57, %v2634_v44 }
 0x415   :  { %v1066_v55 = vmul.f32 %v1062_v58, %v2636_v45 }
 0x416   :  { %v2681_v10 = vadd.f32 %v1067_v60, %v1065_v51 }
 0x417   :  { %v2683_v12 = vadd.f32 %v1068_v9, %v1066_v55 }
 0x418   :  { %2128 = vtanh.f32 %v2681_v10 }
 0x419   :  { %2130 = vtanh.f32 %v2683_v12 }
 0x425   :  { %v2129_v14 = vpop.eup %2128 }
 0x426   :  { %v2131_v17 = vpop.eup %2130  ;;  %v1077_v61 = vmul.f32 %v2129_v14, %v1073_v13 }
 0x427   :  { %v1078_v43 = vmul.f32 %v2131_v17, %v1074_v15 }
 0x428   :  { %v1083_v56 = vpack.c.bf16 %v1077_v61, %v1077_v61 }
 0x429   :  { %v1084_v44 = vpack.c.bf16 %v1078_v43, %v1078_v43 }
 0x42a   :  { %v1087_v63 = vunpack.c.l.b16 %v1083_v56 }
 0x42b   :  { %v1088_v62 = vunpack.c.l.b16 %v1084_v44 }
 0x42d   :  { %v1089_v45 = vrot.slane %v1088_v62, 7 }
 0x42f   :  { %v1090_v0 = vsel %vm573_vm1, %v1089_v45, %v1087_v63 }
 0x430   :  { %v1091_v2 = vpack.c.b16 %v1090_v0, %v1090_v0 }
 0x432   :  { %1126 = vmatmul.mubr.bf16.vlgmr.msra.gmra.mxu0 %v1091_v2  ;;  %1167 = vmatmul.mubr.bf16.vlgmr.msra.gmra.mxu1 %v1091_v2 }
 0x433   :  { %1266 = vmatpush1.bf16.msra.mxu0 %v2691_v8  ;;  %1307 = vmatpush1.bf16.msra.mxu1 %v2697_v11 }
 0x434   :  { %1267 = vmatprep.subr.bf16.mxu0 %v2703_v3  ;;  %1308 = vmatprep.subr.bf16.mxu1 %v2342_v16  ;;  %v2726_v16 = vld [vmem:[%s3034_s4 + $0xa0] ss:$16 sps:$4 sm:$0xff]  }
 0x435   :  { %1297 = vmatprep.mubr.bf16.mxu0 %v2212_v1  ;;  %1338 = vmatprep.mubr.bf16.mxu1 %v2212_v1 }
 0x437   :  { %1268 = vmatpush1.bf16.msra.mxu0 %v2712_v4  ;;  %1309 = vmatpush1.bf16.msra.mxu1 %v2353_v18  ;;  %v2733_v18 = vld [vmem:[%s3034_s4 + $0x84] ss:$16 sps:$4 sm:$0xff]  }
 0x438   :  { %1269 = vmatprep.subr.bf16.mxu0 %v2719_v5  ;;  %1310 = vmatprep.subr.bf16.mxu1 %v2367_v20  ;;  %v2764_v20 = vld [vmem:[%s3034_s4 + $0xec] ss:$16 sps:$4 sm:$0xff]  }
 0x43b   :  { %1270 = vmatpush1.bf16.msra.mxu0 %v2726_v16  ;;  %1311 = vmatpush1.bf16.msra.mxu1 %v2378_v22 }
 0x43c   :  { %1271 = vmatprep.subr.bf16.mxu0 %v2733_v18  ;;  %1312 = vmatprep.subr.bf16.mxu1 %v2392_v24 }
 0x43f   :  { %1272 = vmatpush1.bf16.msra.mxu0 %v2360_v19  ;;  %1313 = vmatpush1.bf16.msra.mxu1 %v2404_v26  ;;  %v2758_v19 = vld [vmem:[%s3034_s4 + $0xe4] ss:$16 sps:$4 sm:$0xff]  }
 0x440   :  { %1273 = vmatprep.subr.bf16.mxu0 %v2372_v21  ;;  %1314 = vmatprep.subr.bf16.mxu1 %v2416_v28 }
 0x443   :  { %1274 = vmatpush1.bf16.msra.mxu0 %v2385_v23  ;;  %1315 = vmatpush1.bf16.msra.mxu1 %v2428_v30 }
 0x444   :  { %1275 = vmatprep.subr.bf16.mxu0 %v2397_v25  ;;  %1316 = vmatprep.subr.bf16.mxu1 %v2440_v32 }
 0x447   :  { %1276 = vmatpush1.bf16.msra.mxu0 %v2409_v27  ;;  %1317 = vmatpush1.bf16.msra.mxu1 %v2452_v34 }
 0x448   :  { %1277 = vmatprep.subr.bf16.mxu0 %v2421_v29  ;;  %1318 = vmatprep.subr.bf16.mxu1 %v2467_v37 }
 0x44b   :  { %1278 = vmatpush1.bf16.msra.mxu0 %v2433_v31  ;;  %1319 = vmatpush1.bf16.msra.mxu1 %v2474_v39  ;;  %v1080_v39 = vld [vmem:[#allocation2 + $0x4] ss:$8 sm:$0xf] }
 0x44c   :  { %1279 = vmatprep.subr.bf16.mxu0 %v2445_v33  ;;  %1320 = vmatprep.subr.bf16.mxu1 %v2480_v40  ;;  %v1082_v40 = vld [vmem:[#allocation2 + $0x24] ss:$8 sm:$0xf] }
 0x44f   :  { %1280 = vmatpush1.bf16.msra.mxu0 %v2457_v35  ;;  %1321 = vmatpush1.bf16.msra.mxu1 %v2487_v41 }
 0x450   :  { %1437 = vmatprep.subr.bf16.mxu0 %v2758_v19  ;;  %1478 = vmatprep.subr.bf16.mxu1 %v2764_v20 }
 0x4f2   :  { %v1127_v21 = vpop.f32.mrf.mxu0  ;;  %v1168_v22 = vpop.f32.mrf.mxu1 }
 0x4f4   :  { %v1129_v23 = vpop.f32.mrf.mxu0  ;;  %v1170_v24 = vpop.f32.mrf.mxu1 }
 0x4f5   :  { %v1179_v25 = vcombine.low %v1127_v21, %v1129_v23  ;;  %v1180_v26 = vcombine.low %v1168_v22, %v1170_v24  ;;  %v2786_v21 = vld [vmem:[%s3034_s4 + $0xcc] ss:$16 sps:$4 sm:$0xff]   ;;  %v2795_v22 = vld [vmem:[%s3034_s4 + $0xc8] ss:$16 sps:$4 sm:$0xff]  }
 0x4f6   :  { %v1131_v27 = vpop.f32.mrf.mxu0  ;;  %v1172_v28 = vpop.f32.mrf.mxu1  ;;  %v2802_v23 = vld [vmem:[%s3034_s4 + $0xac] ss:$16 sps:$4 sm:$0xff]   ;;  %v2809_v24 = vld [vmem:[%s3034_s4 + $0xa8] ss:$16 sps:$4 sm:$0xff]  }
 0x4f7   :  { %v1187_v29 = vrot.slane %v1179_v25, %v2529_v47  ;;  %v1194_v30 = vrot.slane %v1180_v26, %v2529_v47  ;;  %v2816_v25 = vld [vmem:[%s3034_s4 + $0x8c] ss:$16 sps:$4 sm:$0xff]   ;;  %v2822_v26 = vld [vmem:[%s3034_s4 + $0x80] ss:$16 sps:$4 sm:$0xff]   ;;  %v2828_v27 = vld [vmem:[%s3034_s4 + $0x88] ss:$16 sps:$4 sm:$0xff]  }
 0x4f8   :  { %v1132_v31 = vpop.f32.mrf.mxu0  ;;  %v1173_v32 = vpop.f32.mrf.mxu1  ;;  %v2834_v28 = vld [vmem:[%s3034_s4 + $0x64] ss:$16 sps:$4 sm:$0xff]  }
 0x4f9   :  { %v1195_v33 = vcombine.low %v1187_v29, %v1194_v30  ;;  %v1196_v34 = vcombine.high %v1187_v29, %v1194_v30  ;;  %v2840_v29 = vld [vmem:[%s3034_s4 + $0x6c] ss:$16 sps:$4 sm:$0xff]   ;;  %v2846_v30 = vld [vmem:[%s3034_s4 + $0x60] ss:$16 sps:$4 sm:$0xff]   ;;  %v2852_v31 = vld [vmem:[%s3034_s4 + $0x68] ss:$16 sps:$4 sm:$0xff]  }
 0x4fa   :  { %v2858_v32 = vld [vmem:[%s3034_s4 + $0x44] ss:$16 sps:$4 sm:$0xff]  }
 0x4fb   :  { %v1203_v35 = vrot.slane %v1195_v33, %v2529_v47  ;;  %v1210_v37 = vrot.slane %v1196_v34, %v2529_v47  ;;  %v2864_v33 = vld [vmem:[%s3034_s4 + $0x4c] ss:$16 sps:$4 sm:$0xff]   ;;  %v2870_v34 = vld [vmem:[%s3034_s4 + $0x40] ss:$16 sps:$4 sm:$0xff]  }
 0x4fd   :  { %v1213_v41 = vadd.f32 %v1203_v35, %v1080_v39  ;;  %v1214_v6 = vadd.f32 %v1210_v37, %v1082_v40  ;;  %v2876_v35 = vld [vmem:[%s3034_s4 + $0x48] ss:$16 sps:$4 sm:$0xff]   ;;  %v2882_v37 = vld [vmem:[%s3034_s4 + $0x24] ss:$16 sps:$4 sm:$0xff]   ;;  %v2888_v39 = vld [vmem:[%s3034_s4 + $0x2c] ss:$16 sps:$4 sm:$0xff]  }
 0x4fe   :  { %v2894_v40 = vld [vmem:[%s3034_s4 + $0x20] ss:$16 sps:$4 sm:$0xff]  }
 0x4ff   :  { %v1215_v7 = vmul.f32 0.5, %v1213_v41  ;;  %v1216_v36 = vmul.f32 0.5, %v1214_v6  ;;  %v1225_v38 = vrot.slane %v1213_v41, 3  ;;  %v1226_v42 = vrot.slane %v1214_v6, 3  ;;  %v2900_v41 = vld [vmem:[%s3034_s4 + $0x28] ss:$16 sps:$4 sm:$0xff]  }
 0x500   :  { %v2906_v6 = vld [vmem:[%s3034_s4 + $0x4] ss:$16 sps:$4 sm:$0xff]  }
 0x501   :  { %2132 = vtanh.f32 %v1215_v7  ;;  %v2912_v7 = vld [vmem:[%s3034_s4 + $0xc] ss:$16 sps:$4 sm:$0xff]  }
 0x502   :  { %2134 = vtanh.f32 %v1216_v36  ;;  %v2918_v36 = vld [vmem:[%s3034_s4] ss:$16 sps:$4 sm:$0xff]  }
 0x503   :  { %2136 = vtanh.f32 %v1225_v38  ;;  %v2924_v38 = vld [vmem:[%s3034_s4 + $0x8] ss:$16 sps:$4 sm:$0xff]  }
 0x504   :  { %2138 = vtanh.f32 %v1226_v42 }
 0x50e   :  { %v2133_v46 = vpop.eup %2132 }
 0x50f   :  { %v2135_v48 = vpop.eup %2134  ;;  %v1219_v49 = vadd.f32 1.0, %v2133_v46 }
 0x510   :  { %v1220_v52 = vadd.f32 1.0, %v2135_v48  ;;  %v2137_v50 = vpop.eup %2136 }
 0x511   :  { %v1221_v53 = vmul.f32 0.5, %v1219_v49  ;;  %v2139_v59 = vpop.eup %2138 }
 0x512   :  { %v1222_v54 = vmul.f32 0.5, %v1220_v52 }
 0x513   :  { %v1233_v57 = vrot.slane %v1221_v53, 1  ;;  %v1239_v60 = vmul.f32 %v2137_v50, %v1221_v53  ;;  %v1245_v15 = vrot.slane %v1221_v53, 2 }
 0x514   :  { %v1234_v58 = vrot.slane %v1222_v54, 1  ;;  %v1240_v9 = vmul.f32 %v2139_v59, %v1222_v54  ;;  %v1246_v61 = vrot.slane %v1222_v54, 2 }
 0x515   :  { %v1237_v51 = vmul.f32 %v1233_v57, %v2681_v10 }
 0x516   :  { %v1238_v55 = vmul.f32 %v1234_v58, %v2683_v12 }
 0x517   :  { %v2773_v13 = vadd.f32 %v1239_v60, %v1237_v51 }
 0x518   :  { %v2775_v14 = vadd.f32 %v1240_v9, %v1238_v55  ;;  %v1252_v9 = vld [vmem:[#allocation2 + $0x5] ss:$8 sm:$0xf] }
 0x519   :  { %2140 = vtanh.f32 %v2773_v13 }
 0x51a   :  { %2142 = vtanh.f32 %v2775_v14 }
 0x526   :  { %v2141_v17 = vpop.eup %2140 }
 0x527   :  { %v2143_v43 = vpop.eup %2142  ;;  %v1249_v56 = vmul.f32 %v2141_v17, %v1245_v15  ;;  %v1254_v15 = vld [vmem:[#allocation2 + $0x25] ss:$8 sm:$0xf] }
 0x528   :  { %v1250_v44 = vmul.f32 %v2143_v43, %v1246_v61 }
 0x529   :  { %v1255_v62 = vpack.c.bf16 %v1249_v56, %v1249_v56 }
 0x52a   :  { %v1256_v10 = vpack.c.bf16 %v1250_v44, %v1250_v44 }
 0x52b   :  { %v1259_v45 = vunpack.c.l.b16 %v1255_v62 }
 0x52c   :  { %v1260_v63 = vunpack.c.l.b16 %v1256_v10 }
 0x52e   :  { %v1261_v12 = vrot.slane %v1260_v63, 7 }
 0x530   :  { %v1262_v0 = vsel %vm573_vm1, %v1261_v12, %v1259_v45 }
 0x531   :  { %v1263_v2 = vpack.c.b16 %v1262_v0, %v1262_v0 }
 0x533   :  { %1298 = vmatmul.mubr.bf16.vlgmr.msra.gmra.mxu0 %v1263_v2  ;;  %1339 = vmatmul.mubr.bf16.vlgmr.msra.gmra.mxu1 %v1263_v2 }
 0x534   :  { %1438 = vmatpush1.bf16.msra.mxu0 %v2691_v8  ;;  %1479 = vmatpush1.bf16.msra.mxu1 %v2697_v11 }
 0x535   :  { %1439 = vmatprep.subr.bf16.mxu0 %v2703_v3  ;;  %1480 = vmatprep.subr.bf16.mxu1 %v2786_v21 }
 0x536   :  { %1469 = vmatprep.mubr.bf16.mxu0 %v2212_v1  ;;  %1510 = vmatprep.mubr.bf16.mxu1 %v2212_v1 }
 0x538   :  { %1440 = vmatpush1.bf16.msra.mxu0 %v2712_v4  ;;  %1481 = vmatpush1.bf16.msra.mxu1 %v2795_v22 }
 0x539   :  { %1441 = vmatprep.subr.bf16.mxu0 %v2719_v5  ;;  %1482 = vmatprep.subr.bf16.mxu1 %v2802_v23 }
 0x53c   :  { %1442 = vmatpush1.bf16.msra.mxu0 %v2726_v16  ;;  %1483 = vmatpush1.bf16.msra.mxu1 %v2809_v24 }
 0x53d   :  { %1443 = vmatprep.subr.bf16.mxu0 %v2733_v18  ;;  %1484 = vmatprep.subr.bf16.mxu1 %v2816_v25 }
 0x540   :  { %1444 = vmatpush1.bf16.msra.mxu0 %v2822_v26  ;;  %1485 = vmatpush1.bf16.msra.mxu1 %v2828_v27 }
 0x541   :  { %1445 = vmatprep.subr.bf16.mxu0 %v2834_v28  ;;  %1486 = vmatprep.subr.bf16.mxu1 %v2840_v29 }
 0x544   :  { %1446 = vmatpush1.bf16.msra.mxu0 %v2846_v30  ;;  %1487 = vmatpush1.bf16.msra.mxu1 %v2852_v31 }
 0x545   :  { %1447 = vmatprep.subr.bf16.mxu0 %v2858_v32  ;;  %1488 = vmatprep.subr.bf16.mxu1 %v2864_v33 }
 0x548   :  { %1448 = vmatpush1.bf16.msra.mxu0 %v2870_v34  ;;  %1489 = vmatpush1.bf16.msra.mxu1 %v2876_v35 }
 0x549   :  { %1449 = vmatprep.subr.bf16.mxu0 %v2882_v37  ;;  %1490 = vmatprep.subr.bf16.mxu1 %v2888_v39 }
 0x54c   :  { %1450 = vmatpush1.bf16.msra.mxu0 %v2894_v40  ;;  %1491 = vmatpush1.bf16.msra.mxu1 %v2900_v41 }
 0x54d   :  { %1451 = vmatprep.subr.bf16.mxu0 %v2906_v6  ;;  %1492 = vmatprep.subr.bf16.mxu1 %v2912_v7 }
 0x550   :  { %1452 = vmatpush1.bf16.msra.mxu0 %v2918_v36  ;;  %1493 = vmatpush1.bf16.msra.mxu1 %v2924_v38 }
 0x551   :  { %1609 = vmatprep.subr.bf16.mxu0 %v2758_v19  ;;  %1650 = vmatprep.subr.bf16.mxu1 %v2764_v20 }
 0x5f3   :  { %v1299_v42 = vpop.f32.mrf.mxu0  ;;  %v1340_v46 = vpop.f32.mrf.mxu1 }
 0x5f5   :  { %v1301_v48 = vpop.f32.mrf.mxu0  ;;  %v1342_v49 = vpop.f32.mrf.mxu1 }
 0x5f6   :  { %v1351_v52 = vcombine.low %v1299_v42, %v1301_v48  ;;  %v1352_v53 = vcombine.low %v1340_v46, %v1342_v49 }
 0x5f7   :  { %v1303_v54 = vpop.f32.mrf.mxu0  ;;  %v1344_v57 = vpop.f32.mrf.mxu1 }
 0x5f8   :  { %v1359_v50 = vrot.slane %v1351_v52, %v2529_v47  ;;  %v1366_v58 = vrot.slane %v1352_v53, %v2529_v47 }
 0x5f9   :  { %v1304_v59 = vpop.f32.mrf.mxu0  ;;  %v1345_v51 = vpop.f32.mrf.mxu1 }
 0x5fa   :  { %v1367_v60 = vcombine.low %v1359_v50, %v1366_v58  ;;  %v1368_v55 = vcombine.high %v1359_v50, %v1366_v58 }
 0x5fc   :  { %v1375_v19 = vrot.slane %v1367_v60, %v2529_v47  ;;  %v1382_v20 = vrot.slane %v1368_v55, %v2529_v47 }
 0x5fe   :  { %v1385_v17 = vadd.f32 %v1375_v19, %v1252_v9  ;;  %v1386_v61 = vadd.f32 %v1382_v20, %v1254_v15 }
 0x600   :  { %v1387_v43 = vmul.f32 0.5, %v1385_v17  ;;  %v1388_v56 = vmul.f32 0.5, %v1386_v61  ;;  %v1397_v44 = vrot.slane %v1385_v17, 3  ;;  %v1398_v62 = vrot.slane %v1386_v61, 3 }
 0x602   :  { %2144 = vtanh.f32 %v1387_v43 }
 0x603   :  { %2146 = vtanh.f32 %v1388_v56 }
 0x604   :  { %2148 = vtanh.f32 %v1397_v44 }
 0x605   :  { %2150 = vtanh.f32 %v1398_v62 }
 0x60f   :  { %v2145_v10 = vpop.eup %2144 }
 0x610   :  { %v2147_v63 = vpop.eup %2146  ;;  %v1391_v45 = vadd.f32 1.0, %v2145_v10 }
 0x611   :  { %v1392_v12 = vadd.f32 1.0, %v2147_v63  ;;  %v2149_v46 = vpop.eup %2148 }
 0x612   :  { %v1393_v0 = vmul.f32 0.5, %v1391_v45  ;;  %v2151_v49 = vpop.eup %2150 }
 0x613   :  { %v1394_v2 = vmul.f32 0.5, %v1392_v12 }
 0x614   :  { %v1405_v42 = vrot.slane %v1393_v0, 1  ;;  %v1411_v53 = vmul.f32 %v2149_v46, %v1393_v0  ;;  %v1417_v59 = vrot.slane %v1393_v0, 2 }
 0x615   :  { %v1406_v48 = vrot.slane %v1394_v2, 1  ;;  %v1412_v57 = vmul.f32 %v2151_v49, %v1394_v2  ;;  %v1418_v60 = vrot.slane %v1394_v2, 2 }
 0x616   :  { %v1409_v52 = vmul.f32 %v1405_v42, %v2773_v13 }
 0x617   :  { %v1410_v54 = vmul.f32 %v1406_v48, %v2775_v14 }
 0x618   :  { %v2935_v50 = vadd.f32 %v1411_v53, %v1409_v52 }
 0x619   :  { %v2937_v58 = vadd.f32 %v1412_v57, %v1410_v54 }
 0x61a   :  { %2152 = vtanh.f32 %v2935_v50 }
 0x61b   :  { %2154 = vtanh.f32 %v2937_v58 }
 0x627   :  { %v2153_v51 = vpop.eup %2152 }
 0x628   :  { %v2155_v55 = vpop.eup %2154  ;;  %v1421_v19 = vmul.f32 %v2153_v51, %v1417_v59 }
 0x629   :  { %v1422_v20 = vmul.f32 %v2155_v55, %v1418_v60  ;;  %v2076_v55 = vld [vmem:[%s3038_s6 + $0x38] sm:$0xff]  }
 0x62a   :  { %v1427_v9 = vpack.c.bf16 %v1421_v19, %v1421_v19  ;;  %v2214_v19 = vmov 0.0  }
 0x62b   :  { %v1428_v13 = vpack.c.bf16 %v1422_v20, %v1422_v20  ;;  %v2077_v20 = vld [vmem:[%s3038_s6 + $0x30] sm:$0xff]  }
 0x62c   :  { %v1431_v17 = vunpack.c.l.b16 %v1427_v9  ;;  %v2078_v9 = vld [vmem:[%s3038_s6 + $0x28] sm:$0xff]  }
 0x62d   :  { %v1432_v15 = vunpack.c.l.b16 %v1428_v13  ;;  %v2079_v13 = vld [vmem:[%s3038_s6 + $0x20] sm:$0xff]  }
 0x62f   :  { %v1433_v14 = vrot.slane %v1432_v15, 7  ;;  %v2080_v15 = vld [vmem:[%s3038_s6 + $0x18] sm:$0xff]  }
 0x631   :  { %v1434_v61 = vsel %vm573_vm1, %v1433_v14, %v1431_v17  ;;  %v2081_v17 = vld [vmem:[%s3038_s6 + $0x10] sm:$0xff]   ;;  %v2082_v14 = vld [vmem:[%s3038_s6 + $0x8] sm:$0xff]  }
 0x632   :  { %v1435_v43 = vpack.c.b16 %v1434_v61, %v1434_v61  ;;  %v2083_v61 = vld [vmem:[%s3038_s6] sm:$0xff]  }
 0x634   :  { %1470 = vmatmul.mubr.bf16.vlgmr.msra.gmra.mxu0 %v1435_v43  ;;  %1511 = vmatmul.mubr.bf16.vlgmr.msra.gmra.mxu1 %v1435_v43 }
 0x635   :  { %1610 = vmatpush1.bf16.msra.mxu0 %v2691_v8  ;;  %1651 = vmatpush1.bf16.msra.mxu1 %v2697_v11 }
 0x636   :  { %1611 = vmatprep.subr.bf16.mxu0 %v2703_v3  ;;  %1652 = vmatprep.subr.bf16.mxu1 %v2786_v21 }
 0x637   :  { %1641 = vmatprep.mubr.bf16.mxu0 %v2212_v1  ;;  %1682 = vmatprep.mubr.bf16.mxu1 %v2212_v1 }
 0x639   :  { %1612 = vmatpush1.bf16.msra.mxu0 %v2712_v4  ;;  %1653 = vmatpush1.bf16.msra.mxu1 %v2795_v22 }
 0x63a   :  { %1613 = vmatprep.subr.bf16.mxu0 %v2719_v5  ;;  %1654 = vmatprep.subr.bf16.mxu1 %v2802_v23 }
 0x63d   :  { %1614 = vmatpush1.bf16.msra.mxu0 %v2726_v16  ;;  %1655 = vmatpush1.bf16.msra.mxu1 %v2809_v24 }
 0x63e   :  { %1615 = vmatprep.subr.bf16.mxu0 %v2733_v18  ;;  %1656 = vmatprep.subr.bf16.mxu1 %v2816_v25 }
 0x641   :  { %1616 = vmatpush1.bf16.msra.mxu0 %v2822_v26  ;;  %1657 = vmatpush1.bf16.msra.mxu1 %v2828_v27 }
 0x642   :  { %1617 = vmatprep.subr.bf16.mxu0 %v2834_v28  ;;  %1658 = vmatprep.subr.bf16.mxu1 %v2840_v29  ;;  %v1424_v29 = vld [vmem:[#allocation2 + $0x6] ss:$8 sm:$0xf] }
 0x645   :  { %1618 = vmatpush1.bf16.msra.mxu0 %v2846_v30  ;;  %1659 = vmatpush1.bf16.msra.mxu1 %v2852_v31  ;;  %v1426_v30 = vld [vmem:[#allocation2 + $0x26] ss:$8 sm:$0xf] }
 0x646   :  { %1619 = vmatprep.subr.bf16.mxu0 %v2858_v32  ;;  %1660 = vmatprep.subr.bf16.mxu1 %v2864_v33 }
 0x649   :  { %1620 = vmatpush1.bf16.msra.mxu0 %v2870_v34  ;;  %1661 = vmatpush1.bf16.msra.mxu1 %v2876_v35 }
 0x64a   :  { %1621 = vmatprep.subr.bf16.mxu0 %v2882_v37  ;;  %1662 = vmatprep.subr.bf16.mxu1 %v2888_v39 }
 0x64d   :  { %1622 = vmatpush1.bf16.msra.mxu0 %v2894_v40  ;;  %1663 = vmatpush1.bf16.msra.mxu1 %v2900_v41 }
 0x64e   :  { %1623 = vmatprep.subr.bf16.mxu0 %v2906_v6  ;;  %1664 = vmatprep.subr.bf16.mxu1 %v2912_v7 }
 0x651   :  { %1624 = vmatpush1.bf16.msra.mxu0 %v2918_v36  ;;  %1665 = vmatpush1.bf16.msra.mxu1 %v2924_v38 }
 0x652   :  { %1998 = vmatprep.subr.bf16.mxu0 %v2214_v19 }
 0x6f4   :  { %v1471_v1 = vpop.f32.mrf.mxu0  ;;  %v1512_v8 = vpop.f32.mrf.mxu1 }
 0x6f6   :  { %v1473_v11 = vpop.f32.mrf.mxu0  ;;  %v1514_v3 = vpop.f32.mrf.mxu1 }
 0x6f7   :  { %v1523_v4 = vcombine.low %v1471_v1, %v1473_v11  ;;  %v1524_v5 = vcombine.low %v1512_v8, %v1514_v3 }
 0x6f8   :  { %v1475_v16 = vpop.f32.mrf.mxu0  ;;  %v1516_v18 = vpop.f32.mrf.mxu1 }
 0x6f9   :  { %v1531_v21 = vrot.slane %v1523_v4, %v2529_v47  ;;  %v1538_v22 = vrot.slane %v1524_v5, %v2529_v47 }
 0x6fa   :  { %v1476_v23 = vpop.f32.mrf.mxu0  ;;  %v1517_v24 = vpop.f32.mrf.mxu1 }
 0x6fb   :  { %v1539_v25 = vcombine.low %v1531_v21, %v1538_v22  ;;  %v1540_v26 = vcombine.high %v1531_v21, %v1538_v22 }
 0x6fd   :  { %v1547_v27 = vrot.slane %v1539_v25, %v2529_v47  ;;  %v1554_v28 = vrot.slane %v1540_v26, %v2529_v47 }
 0x6ff   :  { %v1557_v31 = vadd.f32 %v1547_v27, %v1424_v29  ;;  %v1558_v32 = vadd.f32 %v1554_v28, %v1426_v30  ;;  %v1596_v28 = vld [vmem:[#allocation2 + $0x7] ss:$8 sm:$0xf] }
 0x700   :  { %v1598_v29 = vld [vmem:[#allocation2 + $0x27] ss:$8 sm:$0xf] }
 0x701   :  { %v1559_v33 = vmul.f32 0.5, %v1557_v31  ;;  %v1560_v34 = vmul.f32 0.5, %v1558_v32  ;;  %v1569_v35 = vrot.slane %v1557_v31, 3  ;;  %v1570_v37 = vrot.slane %v1558_v32, 3 }
 0x703   :  { %2156 = vtanh.f32 %v1559_v33 }
 0x704   :  { %2158 = vtanh.f32 %v1560_v34 }
 0x705   :  { %2160 = vtanh.f32 %v1569_v35 }
 0x706   :  { %2162 = vtanh.f32 %v1570_v37 }
 0x710   :  { %v2157_v39 = vpop.eup %2156 }
 0x711   :  { %v2159_v40 = vpop.eup %2158  ;;  %v1563_v41 = vadd.f32 1.0, %v2157_v39 }
 0x712   :  { %v1564_v6 = vadd.f32 1.0, %v2159_v40  ;;  %v2161_v56 = vpop.eup %2160 }
 0x713   :  { %v1565_v7 = vmul.f32 0.5, %v1563_v41  ;;  %v2163_v62 = vpop.eup %2162 }
 0x714   :  { %v1566_v36 = vmul.f32 0.5, %v1564_v6 }
 0x715   :  { %v1577_v38 = vrot.slane %v1565_v7, 1  ;;  %v1583_v63 = vmul.f32 %v2161_v56, %v1565_v7  ;;  %v1589_v42 = vrot.slane %v1565_v7, 2 }
 0x716   :  { %v1578_v44 = vrot.slane %v1566_v36, 1  ;;  %v1584_v12 = vmul.f32 %v2163_v62, %v1566_v36  ;;  %v1590_v48 = vrot.slane %v1566_v36, 2 }
 0x717   :  { %v1581_v10 = vmul.f32 %v1577_v38, %v2935_v50 }
 0x718   :  { %v1582_v45 = vmul.f32 %v1578_v44, %v2937_v58 }
 0x719   :  { %v2980_v0 = vadd.f32 %v1583_v63, %v1581_v10 }
 0x71a   :  { %v2982_v2 = vadd.f32 %v1584_v12, %v1582_v45 }
 0x71b   :  { %2164 = vtanh.f32 %v2980_v0 }
 0x71c   :  { %2166 = vtanh.f32 %v2982_v2 }
 0x728   :  { %v2165_v46 = vpop.eup %2164 }
 0x729   :  { %v2167_v49 = vpop.eup %2166  ;;  %v1593_v52 = vmul.f32 %v2165_v46, %v1589_v42 }
 0x72a   :  { %v1594_v53 = vmul.f32 %v2167_v49, %v1590_v48 }
 0x72b   :  { %v1599_v54 = vpack.c.bf16 %v1593_v52, %v1593_v52 }
 0x72c   :  { %v1600_v57 = vpack.c.bf16 %v1594_v53, %v1594_v53 }
 0x72d   :  { %v1603_v59 = vunpack.c.l.b16 %v1599_v54 }
 0x72e   :  { %v1604_v50 = vunpack.c.l.b16 %v1600_v57 }
 0x730   :  { %v1605_v58 = vrot.slane %v1604_v50, 7 }
 0x732   :  { %v1606_v51 = vsel %vm573_vm1, %v1605_v58, %v1603_v59 }
 0x733   :  { %v1607_v60 = vpack.c.b16 %v1606_v51, %v1606_v51 }
 0x735   :  { %1642 = vmatmul.mubr.bf16.vlgmr.msra.gmra.mxu0 %v1607_v60  ;;  %1683 = vmatmul.mubr.bf16.vlgmr.msra.gmra.mxu1 %v1607_v60 }
 0x736   :  { %1999 = vmatpush3.bf16.msra.mxu0 %v2076_v55  ;;  %2014 = vmatprep.mubr.msk.bf16.mxu0 %vm2215_vm2, %v2214_v19 }
 0x737   :  { %2000 = vmatprep.subr.bf16.mxu0 %v2214_v19 }
 0x73a   :  { %2001 = vmatpush3.bf16.msra.mxu0 %v2077_v20 }
 0x73b   :  { %2002 = vmatprep.subr.bf16.mxu0 %v2214_v19 }
 0x73e   :  { %2003 = vmatpush3.bf16.msra.mxu0 %v2078_v9  ;;  %v1980_v9 = vld [vmem:[%s3041_s7] ss:$0 sm:$0xff] }
 0x73f   :  { %2004 = vmatprep.subr.bf16.mxu0 %v2214_v19 }
 0x742   :  { %2005 = vmatpush3.bf16.msra.mxu0 %v2079_v13 }
 0x743   :  { %2006 = vmatprep.subr.bf16.mxu0 %v2214_v19 }
 0x746   :  { %2007 = vmatpush3.bf16.msra.mxu0 %v2080_v15 }
 0x747   :  { %2008 = vmatprep.subr.bf16.mxu0 %v2214_v19 }
 0x74a   :  { %2009 = vmatpush3.bf16.msra.mxu0 %v2081_v17 }
 0x74b   :  { %2010 = vmatprep.subr.bf16.mxu0 %v2214_v19 }
 0x74e   :  { %2011 = vmatpush3.bf16.msra.mxu0 %v2082_v14 }
 0x74f   :  { %2012 = vmatprep.subr.bf16.mxu0 %v2214_v19 }
 0x752   :  { %2013 = vmatpush3.bf16.msra.mxu0 %v2083_v61 }
 0x7f5   :  { %v1643_v43 = vpop.f32.mrf.mxu0  ;;  %v1684_v1 = vpop.f32.mrf.mxu1 }
 0x7f7   :  { %v1645_v8 = vpop.f32.mrf.mxu0  ;;  %v1686_v11 = vpop.f32.mrf.mxu1 }
 0x7f8   :  { %v1695_v3 = vcombine.low %v1643_v43, %v1645_v8  ;;  %v1696_v4 = vcombine.low %v1684_v1, %v1686_v11 }
 0x7f9   :  { %v1647_v5 = vpop.f32.mrf.mxu0  ;;  %v1688_v16 = vpop.f32.mrf.mxu1 }
 0x7fa   :  { %v1703_v18 = vrot.slane %v1695_v3, %v2529_v47  ;;  %v1710_v21 = vrot.slane %v1696_v4, %v2529_v47 }
 0x7fb   :  { %v1648_v22 = vpop.f32.mrf.mxu0  ;;  %v1689_v23 = vpop.f32.mrf.mxu1 }
 0x7fc   :  { %v1711_v24 = vcombine.low %v1703_v18, %v1710_v21  ;;  %v1712_v25 = vcombine.high %v1703_v18, %v1710_v21 }
 0x7fe   :  { %v1719_v26 = vrot.slane %v1711_v24, %v2529_v47  ;;  %v1726_v27 = vrot.slane %v1712_v25, %v2529_v47 }
 0x800   :  { %v1729_v30 = vadd.f32 %v1719_v26, %v1596_v28  ;;  %v1730_v31 = vadd.f32 %v1726_v27, %v1598_v29 }
 0x802   :  { %v1731_v32 = vmul.f32 0.5, %v1729_v30  ;;  %v1732_v33 = vmul.f32 0.5, %v1730_v31  ;;  %v1741_v34 = vrot.slane %v1729_v30, 3  ;;  %v1742_v35 = vrot.slane %v1730_v31, 3 }
 0x804   :  { %2168 = vtanh.f32 %v1731_v32 }
 0x805   :  { %2170 = vtanh.f32 %v1732_v33 }
 0x806   :  { %2172 = vtanh.f32 %v1741_v34 }
 0x807   :  { %2174 = vtanh.f32 %v1742_v35 }
 0x811   :  { %v2169_v37 = vpop.eup %2168 }
 0x812   :  { %v2171_v39 = vpop.eup %2170  ;;  %v1735_v40 = vadd.f32 1.0, %v2169_v37 }
 0x813   :  { %v1736_v41 = vadd.f32 1.0, %v2171_v39  ;;  %v2173_v38 = vpop.eup %2172 }
 0x814   :  { %v1737_v6 = vmul.f32 0.5, %v1735_v40  ;;  %v2175_v44 = vpop.eup %2174 }
 0x815   :  { %v1738_v7 = vmul.f32 0.5, %v1736_v41 }
 0x816   :  { %v1749_v36 = vrot.slane %v1737_v6, 1  ;;  %v1755_v10 = vmul.f32 %v2173_v38, %v1737_v6 }
 0x817   :  { %v1750_v56 = vrot.slane %v1738_v7, 1  ;;  %v1756_v63 = vmul.f32 %v2175_v44, %v1738_v7  ;;  %v1762_v58 = vrot.slane %v1738_v7, 2 }
 0x818   :  { %v1753_v62 = vmul.f32 %v1749_v36, %v2980_v0 }
 0x819   :  { %v1754_v45 = vmul.f32 %v1750_v56, %v2982_v2  ;;  %v1761_v2 = vrot.slane %v1737_v6, 2 }
 0x81a   :  { %v1757_v12 = vadd.f32 %v1755_v10, %v1753_v62 }
 0x81b   :  { %v1758_v42 = vadd.f32 %v1756_v63, %v1754_v45 }
 0x81c   :  { %2176 = vtanh.f32 %v1757_v12  ;;  %v1805_v48 = vpack.c.bf16 %v1757_v12, %v1757_v12 }
 0x81d   :  { %2178 = vtanh.f32 %v1758_v42  ;;  %v1788_v46 = vcombine.low %v1757_v12, %v1758_v42  ;;  %v1806_v49 = vpack.c.bf16 %v1758_v42, %v1758_v42 }
 0x81e   :  { %v1832_v54 = vunpack.c.l.b16 %v1805_v48 }
 0x81f   :  { %v1795_v52 = vrot.slane %v1788_v46, %v2529_v47  ;;  %v1833_v53 = vunpack.c.l.b16 %v1806_v49 }
 0x821   :  { %1979 = vst.sshfl [vmem:[%s3039_s10] sm:$0x5 pattern:$0x73625140] %v1795_v52  ;;  %v1834_v0 = vrot.slane %v1833_v53, 7 }
 0x823   :  { %v1835_v57 = vsel %vm573_vm1, %v1834_v0, %v1832_v54 }
 0x824   :  { %v1836_v50 = vpack.c.b16 %v1835_v57, %v1835_v57 }
 0x826   :  { %2015 = vmatmul.mubr.bf16.vlgmr.msra.gmra.mxu0 %v1836_v50 }
 0x829   :  { %v2177_v59 = vpop.eup %2176 }
 0x82a   :  { %v2179_v51 = vpop.eup %2178  ;;  %v1765_v60 = vmul.f32 %v2177_v59, %v1761_v2 }
 0x82b   :  { %v1766_v55 = vmul.f32 %v2179_v51, %v1762_v58 }
 0x82d   :  { %v1769_v19 = vcombine.low %v1765_v60, %v1766_v55 }
 0x82f   :  { %v1776_v20 = vrot.slane %v1769_v19, %v2529_v47 }
 0x831   :  { %1978 = vst.sshfl [vmem:[%s3040_s9] sm:$0x5 pattern:$0x73625140] %v1776_v20 }
 0x8e6   :  { %v1920_v13 = vpop.f32.mrf.mxu0 }
 0x8e7   :  { %v1921_v15 = vadd.f32 %v1980_v9, %v1920_v13 }
 0x8e8   :  { %v2016_v17 = vpop.f32.mrf.mxu0 }
 0x8e9   :  { %1926 = vst [vmem:[%s3042_s8] sm:$0x3] %v1921_v15 }
 0x8ea   :  { %v1923_v14 = vpop.f32.mrf.mxu0 }
 0x8ec   :  { %v2017_v61 = vpop.f32.mrf.mxu0 }

</bundles_post_ra>
